<compile_context>
chip_gen: v7x
topology: tpu7x:2x2x1
jax: 0.10.0
libtpu: 0.0.40
codegen_flags: <defaults>
</compile_context>

<pallas_src>
import functools

import jax
import jax.numpy as jnp
from jax import lax
from jax.experimental import pallas as pl
from jax.experimental.pallas import tpu as pltpu

F32_TINY = float(jnp.finfo(jnp.float32).tiny)
MU_CLAMP_MAX = 1.0e7

# torch.lgamma has no direct Mosaic primitive -> in-kernel Lanczos (g=7) approximation,
# evaluated as a rational polynomial in u = 1/z (2 divides instead of 8 per element).
_LANCZOS_G = 7.0
_LANCZOS_C = (
    0.99999999999980993, 676.5203681218851, -1259.1392167224028,
    771.32342877765313, -176.61502916214059, 12.507343278686905,
    -0.13857109526572012, 9.9843695780195716e-6, 1.5056327351493116e-7,
)
_HALF_LOG_2PI = 0.9189385332046727


def _poly_mul(a, b):
    out = [0.0] * (len(a) + len(b) - 1)
    for i, ai in enumerate(a):
        for j, bj in enumerate(b):
            out[i + j] += ai * bj
    return out


def _lanczos_rational():
    """Coefficients (descending powers of u = 1/z) of num/den such that
    num(u)/den(u) == c0 + sum_{i=1..8} c_i / (z + i - 1)   for z > 0."""
    c = _LANCZOS_C
    # Qr(u) = prod_{k=1..7} (1 + k*u)                (ascending powers of u)
    qr = [1.0]
    for k in range(1, 8):
        qr = _poly_mul(qr, [1.0, float(k)])
    # Pr(u) = c0*Qr(u) + u * sum_i c_i * prod_{k=1..7, k != i-1} (1 + k*u)
    pr = [c[0] * v for v in qr] + [0.0]
    for i in range(1, 9):
        term = [1.0]
        for k in range(1, 8):
            if k == i - 1:
                continue
            term = _poly_mul(term, [1.0, float(k)])
        for d, v in enumerate(term):
            pr[d + 1] += c[i] * v
    return tuple(reversed(pr)), tuple(reversed(qr))


_LG_NUM, _LG_DEN = _lanczos_rational()


def _horner(coeffs, u):
    acc = jnp.full_like(u, coeffs[0])
    for c in coeffs[1:]:
        acc = acc * u + c
    return acc


def _lgamma(x):
    """log(Gamma(x)) for x > 0; Lanczos g=7 as a rational polynomial in 1/z."""
    shift = x < 0.5
    z = jnp.where(shift, x + 1.0, x)        # lgamma(x) = lgamma(x+1) - log(x)
    u = 1.0 / z                              # z >= 0.5  ->  u in (0, 2]
    rat = _horner(_LG_NUM, u) / _horner(_LG_DEN, u)
    t = z + (_LANCZOS_G - 0.5)
    lg = _HALF_LOG_2PI + (z - 0.5) * jnp.log(t) - t + jnp.log(rat)
    return jnp.where(shift, lg - jnp.log(x), lg)


def _softplus(x):
    # numerically stable softplus using only exp/log (Mosaic-safe)
    return jnp.maximum(x, 0.0) + jnp.log(1.0 + jnp.exp(-jnp.abs(x)))


def zinb_kernel(x_ref, w_ref, b_ref, t_ref, out_ref, *,
                n_total, tile_m, n_tiles_total, has_pad):
    o = pl.program_id(0)
    i = pl.program_id(1)
    L = tile_m // 8

    @pl.when(i == 0)
    def _init():
        out_ref[...] = jnp.zeros_like(out_ref)

    # fused linear heads on the MXU: (tile_m, D) @ (D, 128) -> (tile_m, 128)
    y = jnp.dot(x_ref[...], w_ref[...], preferred_element_type=jnp.float32)
    yt = y.T                                     # (128, tile_m); known-good transpose

    def repack(row):
        # (1, tile_m) row of yt -> dense (8, L); element (s, l) <-> tile row s*L + l
        pieces = [yt[row:row + 1, s * L:(s + 1) * L] for s in range(8)]
        return jnp.concatenate(pieces, axis=0)   # (8, L), all slices vreg-aligned

    eps = jnp.float32(F32_TINY)
    mu_lin = repack(0) + b_ref[0]                # (8, L)
    lt0 = repack(1) + b_ref[1]
    pis = repack(2) + b_ref[2]
    t = t_ref[0]                                  # (8, L) targets, lane/sublane dense

    # first "+= tiny" of NegativeBinomialNLL.loss (matters when exp() underflows).
    # The second "+= tiny" chain in ZINB.loss is an f32 no-op and is dropped.
    lt1 = lt0 + eps

    # one stacked exp: [mu_lin; lt1] -> (16, L)
    ex = jnp.exp(jnp.concatenate([mu_lin, lt1], axis=0))
    mu0 = jnp.minimum(ex[0:8, :], MU_CLAMP_MAX)  # clamp(exp(mu), 1e7)
    th1 = ex[8:16, :]
    mu1 = mu0 + eps

    # one stacked lgamma, one stacked log
    lg = _lgamma(jnp.concatenate([th1, t + th1], axis=0))          # (16, L)
    lo = jnp.log(jnp.concatenate([th1 + mu1, mu1], axis=0))        # (16, L)
    log_thmu = lo[0:8, :]
    log_mu = lo[8:16, :]

    nb = (lg[0:8, :] - lg[8:16, :]
          + t * log_thmu - th1 * lt1 - t * log_mu
          + th1 * log_thmu)                                        # (8, L)

    # one stacked softplus on both arguments
    sp = _softplus(jnp.concatenate([-pis, -pis + th1 * (lt1 - log_thmu)], axis=0))
    sp_neg_pi = sp[0:8, :]
    nll_zero = sp_neg_pi - sp[8:16, :]
    pos_part = pis + sp_neg_pi        # NLLifnotzero minus the (scalar) NB mean

    ind = (t > 0.0).astype(jnp.float32)
    vals = (nb, pos_part * ind, ind, nll_zero * (1.0 - ind))

    def _accum(mask=None):
        v = vals if mask is None else tuple(q * mask for q in vals)
        contrib = jnp.stack(v, axis=0)           # (4, 8, L): leading-dim stack only
        out_ref[...] += contrib[None]            # (1, 4, 8, L)

    if has_pad:
        tile_idx = o * pl.num_programs(1) + i
        is_last = tile_idx == (n_tiles_total - 1)

        @pl.when(is_last)                         # mask only where padding can exist
        def _masked():
            row = lax.broadcasted_iota(jnp.int32, (8, L), 0)
            col = lax.broadcasted_iota(jnp.int32, (8, L), 1)
            gidx = tile_idx * tile_m + row * L + col
            _accum((gidx < n_total).astype(jnp.float32))

        @pl.when(jnp.logical_not(is_last))
        def _unmasked():
            _accum()
    else:
        _accum()


def zinb_nll_loss(x, targets, w_head, b_head, w_pi, b_pi, *, tile_m=1024):
    """ZeroInflatedNegativeBinomialNLL.forward(x, targets) -> scalar loss."""
    B, S, D = x.shape
    M = B * S

    def rup(a, b):
        return (a + b - 1) // b * b

    # tile_m must be a multiple of 1024 so L = tile_m//8 is a multiple of 128
    tile_m = max(1024, rup(tile_m, 1024))

    # keep bf16 activations bf16 in HBM (halves the dominant DMA); f32 otherwise
    in_dtype = jnp.bfloat16 if x.dtype == jnp.bfloat16 else jnp.float32
    itemsize = jnp.dtype(in_dtype).itemsize
    # keep the double-buffered x slab comfortably inside the 48 MiB request
    while tile_m > 1024 and 2 * tile_m * D * itemsize > (24 << 20):
        tile_m -= 1024

    xf = x.reshape(M, D).astype(in_dtype)
    tf = targets.reshape(M).astype(jnp.float32)

    # fused weights: (D, 3) lane-padded to (D, 128); cols = [mu, log_theta, pi]
    w = jnp.concatenate([w_head.T, w_pi.T], axis=1).astype(jnp.float32)   # (D, 3)
    w = jnp.pad(w, ((0, 0), (0, 128 - 3))).astype(in_dtype)               # (D, 128)
    # biases as SMEM scalars [b_mu, b_log_theta, b_pi] (always f32)
    b_sm = jnp.concatenate([b_head, b_pi]).astype(jnp.float32)            # (3,)

    n_tiles = pl.cdiv(M, tile_m)
    n_outer = 2 if n_tiles >= 2 else 1          # engage both TCs on v7x
    n_inner = pl.cdiv(n_tiles, n_outer)
    n_tiles_total = n_outer * n_inner
    m_pad = n_tiles_total * tile_m
    has_pad = (m_pad != M)
    if has_pad:
        xf = jnp.pad(xf, ((0, m_pad - M), (0, 0)))
        tf = jnp.pad(tf, ((0, m_pad - M),))
    L = tile_m // 8
    tf = tf.reshape(n_tiles_total, 8, L)        # dense (8, L) row-major targets

    kernel = functools.partial(zinb_kernel, n_total=M, tile_m=tile_m,
                               n_tiles_total=n_tiles_total, has_pad=has_pad)

    vmem_need = (2 * tile_m * D * itemsize          # double-buffered x tile
                 + 2 * D * 128 * itemsize           # fused weight
                 + 2 * tile_m * 128 * 4             # y and y.T f32 intermediates
                 + 2 * (4 * 8 * L + 8 * L) * 4      # out block + targets
                 + (2 << 20))                       # misc temporaries
    # cap at 48 MiB: v7x has only 64 MiB VMEM per TensorCore
    vmem_limit = int(min(max(vmem_need, 32 << 20), 48 << 20))

    bytes_accessed = (xf.size * itemsize + tf.size * 4
                      + w.size * itemsize + 16 + n_outer * 4 * 8 * L * 4)
    cost = pl.CostEstimate(
        flops=int(2 * m_pad * D * 128 + 200 * m_pad),
        transcendentals=int(18 * m_pad),
        bytes_accessed=int(bytes_accessed))

    # TODO(synk): pipeline_mode=pl.Buffered(1) on the resident weight BlockSpec would
    # save one weight copy of VMEM on v7x; left out to keep lowering risk minimal.
    partials = pl.pallas_call(
        kernel,
        out_shape=jax.ShapeDtypeStruct((n_outer, 4, 8, L), jnp.float32),
        grid_spec=pltpu.PrefetchScalarGridSpec(
            num_scalar_prefetch=0,
            grid=(n_outer, n_inner),
            in_specs=[
                pl.BlockSpec((tile_m, D), lambda o, i: (o * n_inner + i, 0)),   # x rows
                pl.BlockSpec((D, 128), lambda o, i: (0, 0)),                    # fused weight
                pl.BlockSpec(memory_space=pltpu.MemorySpace.SMEM),              # biases (3,)
                pl.BlockSpec((1, 8, L), lambda o, i: (o * n_inner + i, 0, 0)),  # targets
            ],
            out_specs=pl.BlockSpec((1, 4, 8, L), lambda o, i: (o, 0, 0, 0)),
        ),
        compiler_params=pltpu.CompilerParams(
            dimension_semantics=("parallel", "arbitrary"),
            vmem_limit_bytes=vmem_limit),
        cost_estimate=cost,
    )(xf, w, b_sm, tf)

    # tiny final combine in plain JAX
    sums = jnp.sum(partials, axis=(0, 2, 3))        # (4,)
    n = jnp.float32(M)
    nb_mean = sums[0] / n                           # reduce='mean' of the NB NLL
    # mean( NLLifnotzero*ind + NLLifzero*~ind )
    return (sums[1] + nb_mean * sums[2] + sums[3]) / n


def reference(x, targets, w_head, b_head, w_pi, b_pi):
    """Pure-JAX replica of the PyTorch forward (for validation)."""
    y = x @ w_head.T + b_head
    mus = jnp.minimum(jnp.exp(y[..., 0]), MU_CLAMP_MAX)
    log_thetas = y[..., 1]
    pis = (x @ w_pi.T + b_pi)[..., 0]
    eps = jnp.float32(F32_TINY)

    lt1 = log_thetas + eps
    th1 = jnp.exp(lt1)
    mu1 = mus + eps
    nb = (jax.scipy.special.gammaln(th1) - jax.scipy.special.gammaln(targets + th1)
          + targets * jnp.log(th1 + mu1) - th1 * lt1 - targets * jnp.log(mu1)
          + th1 * jnp.log(th1 + mu1))
    nb_mean = jnp.mean(nb)

    mu2 = mu1 + eps
    lt2 = lt1 + eps
    th2 = jnp.exp(lt2)
    ind = targets > 0
    sp = jax.nn.softplus
    nll_zero = sp(-pis) - sp(-pis + th2 * (lt2 - jnp.log(th2 + mu2)))
    nll_notzero = pis + sp(-pis) + nb_mean
    return jnp.mean(jnp.where(ind, nll_notzero, nll_zero))


if __name__ == "__main__":
    B, S, D = 2, 8, 32
    key = jax.random.PRNGKey(0)
    ks = jax.random.split(key, 6)
    bound = 1.0 / float(D) ** 0.5

    # deterministic Linear params (nn.Linear default uniform(-1/sqrt(D), 1/sqrt(D)))
    w_head = jax.random.uniform(ks[0], (2, D), jnp.float32, -bound, bound)
    b_head = jax.random.uniform(ks[1], (2,), jnp.float32, -bound, bound)
    w_pi = jax.random.uniform(ks[2], (1, D), jnp.float32, -bound, bound)
    b_pi = jax.random.uniform(ks[3], (1,), jnp.float32, -bound, bound)

    x = jax.random.normal(ks[4], (B, S, D), jnp.float32)
    targets = jax.random.randint(ks[5], (B, S), 0, 4).astype(jnp.float32)

    loss = zinb_nll_loss(x, targets, w_head, b_head, w_pi, b_pi)
    loss = jax.block_until_ready(loss)

    ref = reference(x, targets, w_head, b_head, w_pi, b_pi)
    assert jnp.allclose(loss, ref, rtol=2e-3, atol=2e-3), (float(loss), float(ref))
    print("KERNEL_OK")
</pallas_src>

<mosaic_0001>
module attributes {stable_mosaic.version = 11 : i64} {
  func.func @zinb_kernel(%arg0: i32, %arg1: i32, %arg2: memref<1024x32xf32, #tpu.memory_space<vmem>>, %arg3: memref<32x128xf32, #tpu.memory_space<vmem>>, %arg4: memref<3xf32, #tpu.memory_space<smem>>, %arg5: memref<1x8x128xf32, #tpu.memory_space<vmem>>, %arg6: memref<1x4x8x128xf32, #tpu.memory_space<vmem>>) attributes {dimension_semantics = [#tpu.dimension_semantics<parallel>, #tpu.dimension_semantics<arbitrary>], iteration_bounds = array<i64: 1, 1>, scalar_prefetch = 0 : i64, scratch_operands = 0 : i64, tpu.core_type = #tpu.core_type<tc>, window_params = [{transform_indices = @transform_0, window_bounds = array<i64: 1024, 32>}, {pipeline_mode = #tpu.pipeline_mode<synchronous>, transform_indices = @transform_1, window_bounds = array<i64: 32, 128>}, {transform_indices = @transform_2, window_bounds = array<i64: 3>}, {transform_indices = @transform_3, window_bounds = array<i64: 1, 8, 128>}, {transform_indices = @transform_4, window_bounds = array<i64: 1, 4, 8, 128>}]} {
    %c0_i32 = arith.constant 0 : i32
    %0 = arith.cmpi eq, %arg1, %c0_i32 : i32
    %1 = arith.extui %0 : i1 to i32
    %c0_i32_0 = arith.constant 0 : i32
    %2 = arith.cmpi ne, %1, %c0_i32_0 : i32
    scf.if %2 {
      %cst_44 = arith.constant 0.000000e+00 : f32
      %180 = vector.broadcast %cst_44 : f32 to vector<1x4x8x128xf32>
      %c0_45 = arith.constant 0 : index
      %c0_46 = arith.constant 0 : index
      %c0_47 = arith.constant 0 : index
      %c0_48 = arith.constant 0 : index
      %181 = vector.load %arg6[%c0_45, %c0_46, %c0_47, %c0_48] : memref<1x4x8x128xf32, #tpu.memory_space<vmem>>, vector<1x4x8x128xf32>
      tpu.vector_store %arg6[%c0_45, %c0_46, %c0_47, %c0_48], %180 {strides = array<i32>} : memref<1x4x8x128xf32, #tpu.memory_space<vmem>>, vector<1x4x8x128xf32>,
    } else {
    }
    %c0 = arith.constant 0 : index
    %c0_1 = arith.constant 0 : index
    %3 = vector.load %arg2[%c0, %c0_1] : memref<1024x32xf32, #tpu.memory_space<vmem>>, vector<1024x32xf32>
    %c0_2 = arith.constant 0 : index
    %c0_3 = arith.constant 0 : index
    %4 = vector.load %arg3[%c0_2, %c0_3] : memref<32x128xf32, #tpu.memory_space<vmem>>, vector<32x128xf32>
    %cst = arith.constant dense<0.000000e+00> : vector<1024x128xf32>
    %5 = tpu.matmul %3, %4, %cst {dimension_numbers = #tpu.dot_dimension_numbers<[1], [0], [0], [1], [0, 0, 1, 1], [], []>} : vector<1024x32xf32>, vector<32x128xf32>, vector<1024x128xf32> -> vector<1024x128xf32>
    %6 = tpu.transpose %5, [1, 0] : vector<1024x128xf32> -> vector<128x1024xf32>
    %7 = vector.extract_strided_slice %6 {offsets = [0, 0], sizes = [1, 128], strides = [1, 1]} : vector<128x1024xf32> to vector<1x128xf32>
    %8 = vector.extract_strided_slice %6 {offsets = [0, 128], sizes = [1, 128], strides = [1, 1]} : vector<128x1024xf32> to vector<1x128xf32>
    %9 = vector.extract_strided_slice %6 {offsets = [0, 256], sizes = [1, 128], strides = [1, 1]} : vector<128x1024xf32> to vector<1x128xf32>
    %10 = vector.extract_strided_slice %6 {offsets = [0, 384], sizes = [1, 128], strides = [1, 1]} : vector<128x1024xf32> to vector<1x128xf32>
    %11 = vector.extract_strided_slice %6 {offsets = [0, 512], sizes = [1, 128], strides = [1, 1]} : vector<128x1024xf32> to vector<1x128xf32>
    %12 = vector.extract_strided_slice %6 {offsets = [0, 640], sizes = [1, 128], strides = [1, 1]} : vector<128x1024xf32> to vector<1x128xf32>
    %13 = vector.extract_strided_slice %6 {offsets = [0, 768], sizes = [1, 128], strides = [1, 1]} : vector<128x1024xf32> to vector<1x128xf32>
    %14 = vector.extract_strided_slice %6 {offsets = [0, 896], sizes = [1, 128], strides = [1, 1]} : vector<128x1024xf32> to vector<1x128xf32>
    %15 = tpu.concatenate %7, %8, %9, %10, %11, %12, %13, %14 in 0 : vector<1x128xf32>, vector<1x128xf32>, vector<1x128xf32>, vector<1x128xf32>, vector<1x128xf32>, vector<1x128xf32>, vector<1x128xf32>, vector<1x128xf32> -> vector<8x128xf32>
    %c0_4 = arith.constant 0 : index
    %16 = memref.load %arg4[%c0_4] : memref<3xf32, #tpu.memory_space<smem>>
    %17 = vector.broadcast %16 : f32 to vector<8x128xf32>
    %18 = arith.addf %15, %17 : vector<8x128xf32>
    %19 = vector.extract_strided_slice %6 {offsets = [1, 0], sizes = [1, 128], strides = [1, 1]} : vector<128x1024xf32> to vector<1x128xf32>
    %20 = vector.extract_strided_slice %6 {offsets = [1, 128], sizes = [1, 128], strides = [1, 1]} : vector<128x1024xf32> to vector<1x128xf32>
    %21 = vector.extract_strided_slice %6 {offsets = [1, 256], sizes = [1, 128], strides = [1, 1]} : vector<128x1024xf32> to vector<1x128xf32>
    %22 = vector.extract_strided_slice %6 {offsets = [1, 384], sizes = [1, 128], strides = [1, 1]} : vector<128x1024xf32> to vector<1x128xf32>
    %23 = vector.extract_strided_slice %6 {offsets = [1, 512], sizes = [1, 128], strides = [1, 1]} : vector<128x1024xf32> to vector<1x128xf32>
    %24 = vector.extract_strided_slice %6 {offsets = [1, 640], sizes = [1, 128], strides = [1, 1]} : vector<128x1024xf32> to vector<1x128xf32>
    %25 = vector.extract_strided_slice %6 {offsets = [1, 768], sizes = [1, 128], strides = [1, 1]} : vector<128x1024xf32> to vector<1x128xf32>
    %26 = vector.extract_strided_slice %6 {offsets = [1, 896], sizes = [1, 128], strides = [1, 1]} : vector<128x1024xf32> to vector<1x128xf32>
    %27 = tpu.concatenate %19, %20, %21, %22, %23, %24, %25, %26 in 0 : vector<1x128xf32>, vector<1x128xf32>, vector<1x128xf32>, vector<1x128xf32>, vector<1x128xf32>, vector<1x128xf32>, vector<1x128xf32>, vector<1x128xf32> -> vector<8x128xf32>
    %c1 = arith.constant 1 : index
    %28 = memref.load %arg4[%c1] : memref<3xf32, #tpu.memory_space<smem>>
    %29 = vector.broadcast %28 : f32 to vector<8x128xf32>
    %30 = arith.addf %27, %29 : vector<8x128xf32>
    %31 = vector.extract_strided_slice %6 {offsets = [2, 0], sizes = [1, 128], strides = [1, 1]} : vector<128x1024xf32> to vector<1x128xf32>
    %32 = vector.extract_strided_slice %6 {offsets = [2, 128], sizes = [1, 128], strides = [1, 1]} : vector<128x1024xf32> to vector<1x128xf32>
    %33 = vector.extract_strided_slice %6 {offsets = [2, 256], sizes = [1, 128], strides = [1, 1]} : vector<128x1024xf32> to vector<1x128xf32>
    %34 = vector.extract_strided_slice %6 {offsets = [2, 384], sizes = [1, 128], strides = [1, 1]} : vector<128x1024xf32> to vector<1x128xf32>
    %35 = vector.extract_strided_slice %6 {offsets = [2, 512], sizes = [1, 128], strides = [1, 1]} : vector<128x1024xf32> to vector<1x128xf32>
    %36 = vector.extract_strided_slice %6 {offsets = [2, 640], sizes = [1, 128], strides = [1, 1]} : vector<128x1024xf32> to vector<1x128xf32>
    %37 = vector.extract_strided_slice %6 {offsets = [2, 768], sizes = [1, 128], strides = [1, 1]} : vector<128x1024xf32> to vector<1x128xf32>
    %38 = vector.extract_strided_slice %6 {offsets = [2, 896], sizes = [1, 128], strides = [1, 1]} : vector<128x1024xf32> to vector<1x128xf32>
    %39 = tpu.concatenate %31, %32, %33, %34, %35, %36, %37, %38 in 0 : vector<1x128xf32>, vector<1x128xf32>, vector<1x128xf32>, vector<1x128xf32>, vector<1x128xf32>, vector<1x128xf32>, vector<1x128xf32>, vector<1x128xf32> -> vector<8x128xf32>
    %c2 = arith.constant 2 : index
    %40 = memref.load %arg4[%c2] : memref<3xf32, #tpu.memory_space<smem>>
    %41 = vector.broadcast %40 : f32 to vector<8x128xf32>
    %42 = arith.addf %39, %41 : vector<8x128xf32>
    %c0_5 = arith.constant 0 : index
    %c0_6 = arith.constant 0 : index
    %c0_7 = arith.constant 0 : index
    %43 = vector.load %arg5[%c0_5, %c0_6, %c0_7] : memref<1x8x128xf32, #tpu.memory_space<vmem>>, vector<1x8x128xf32>
    %44 = vector.shape_cast %43 : vector<1x8x128xf32> to vector<8x128xf32>
    %cst_8 = arith.constant 1.17549435E-38 : f32
    %45 = vector.broadcast %cst_8 : f32 to vector<8x128xf32>
    %46 = arith.addf %30, %45 : vector<8x128xf32>
    %47 = tpu.concatenate %18, %46 in 0 : vector<8x128xf32>, vector<8x128xf32> -> vector<16x128xf32>
    %48 = math.exp %47 : vector<16x128xf32>
    %49 = vector.extract_strided_slice %48 {offsets = [0, 0], sizes = [8, 128], strides = [1, 1]} : vector<16x128xf32> to vector<8x128xf32>
    %cst_9 = arith.constant 1.000000e+07 : f32
    %50 = vector.broadcast %cst_9 : f32 to vector<8x128xf32>
    %51 = arith.minimumf %49, %50 : vector<8x128xf32>
    %52 = vector.extract_strided_slice %48 {offsets = [8, 0], sizes = [8, 128], strides = [1, 1]} : vector<16x128xf32> to vector<8x128xf32>
    %cst_10 = arith.constant 1.17549435E-38 : f32
    %53 = vector.broadcast %cst_10 : f32 to vector<8x128xf32>
    %54 = arith.addf %51, %53 : vector<8x128xf32>
    %55 = arith.addf %44, %52 : vector<8x128xf32>
    %56 = tpu.concatenate %52, %55 in 0 : vector<8x128xf32>, vector<8x128xf32> -> vector<16x128xf32>
    %cst_11 = arith.constant 5.000000e-01 : f32
    %57 = vector.broadcast %cst_11 : f32 to vector<16x128xf32>
    %58 = arith.cmpf olt, %56, %57 : vector<16x128xf32>
    %cst_12 = arith.constant 1.000000e+00 : f32
    %59 = vector.broadcast %cst_12 : f32 to vector<16x128xf32>
    %60 = arith.addf %56, %59 : vector<16x128xf32>
    %61 = arith.select %58, %60, %56 : vector<16x128xi1>, vector<16x128xf32>
    %cst_13 = arith.constant 1.000000e+00 : f32
    %62 = vector.broadcast %cst_13 : f32 to vector<16x128xf32>
    %63 = arith.divf %62, %61 : vector<16x128xf32>
    %cst_14 = arith.constant 3409662.75 : f32
    %64 = vector.broadcast %cst_14 : f32 to vector<16x128xf32>
    %65 = arith.mulf %64, %63 : vector<16x128xf32>
    %cst_15 = arith.constant 0x4A7E0D50 : f32
    %66 = vector.broadcast %cst_15 : f32 to vector<16x128xf32>
    %67 = arith.addf %65, %66 : vector<16x128xf32>
    %68 = arith.mulf %67, %63 : vector<16x128xf32>
    %cst_16 = arith.constant 2222880.5 : f32
    %69 = vector.broadcast %cst_16 : f32 to vector<16x128xf32>
    %70 = arith.addf %68, %69 : vector<16x128xf32>
    %71 = arith.mulf %70, %63 : vector<16x128xf32>
    %cst_17 = arith.constant 678289.688 : f32
    %72 = vector.broadcast %cst_17 : f32 to vector<16x128xf32>
    %73 = arith.addf %71, %72 : vector<16x128xf32>
    %74 = arith.mulf %73, %63 : vector<16x128xf32>
    %cst_18 = arith.constant 129347.258 : f32
    %75 = vector.broadcast %cst_18 : f32 to vector<16x128xf32>
    %76 = arith.addf %74, %75 : vector<16x128xf32>
    %77 = arith.mulf %76, %63 : vector<16x128xf32>
    %cst_19 = arith.constant 15784.8809 : f32
    %78 = vector.broadcast %cst_19 : f32 to vector<16x128xf32>
    %79 = arith.addf %77, %78 : vector<16x128xf32>
    %80 = arith.mulf %79, %63 : vector<16x128xf32>
    %cst_20 = arith.constant 1203.83423 : f32
    %81 = vector.broadcast %cst_20 : f32 to vector<16x128xf32>
    %82 = arith.addf %80, %81 : vector<16x128xf32>
    %83 = arith.mulf %82, %63 : vector<16x128xf32>
    %cst_21 = arith.constant 52.4583321 : f32
    %84 = vector.broadcast %cst_21 : f32 to vector<16x128xf32>
    %85 = arith.addf %83, %84 : vector<16x128xf32>
    %86 = arith.mulf %85, %63 : vector<16x128xf32>
    %cst_22 = arith.constant 1.000000e+00 : f32
    %87 = vector.broadcast %cst_22 : f32 to vector<16x128xf32>
    %88 = arith.addf %86, %87 : vector<16x128xf32>
    %cst_23 = arith.constant 5.040000e+03 : f32
    %89 = vector.broadcast %cst_23 : f32 to vector<16x128xf32>
    %90 = arith.mulf %89, %63 : vector<16x128xf32>
    %cst_24 = arith.constant 1.306800e+04 : f32
    %91 = vector.broadcast %cst_24 : f32 to vector<16x128xf32>
    %92 = arith.addf %90, %91 : vector<16x128xf32>
    %93 = arith.mulf %92, %63 : vector<16x128xf32>
    %cst_25 = arith.constant 1.313200e+04 : f32
    %94 = vector.broadcast %cst_25 : f32 to vector<16x128xf32>
    %95 = arith.addf %93, %94 : vector<16x128xf32>
    %96 = arith.mulf %95, %63 : vector<16x128xf32>
    %cst_26 = arith.constant 6.769000e+03 : f32
    %97 = vector.broadcast %cst_26 : f32 to vector<16x128xf32>
    %98 = arith.addf %96, %97 : vector<16x128xf32>
    %99 = arith.mulf %98, %63 : vector<16x128xf32>
    %cst_27 = arith.constant 1.960000e+03 : f32
    %100 = vector.broadcast %cst_27 : f32 to vector<16x128xf32>
    %101 = arith.addf %99, %100 : vector<16x128xf32>
    %102 = arith.mulf %101, %63 : vector<16x128xf32>
    %cst_28 = arith.constant 3.220000e+02 : f32
    %103 = vector.broadcast %cst_28 : f32 to vector<16x128xf32>
    %104 = arith.addf %102, %103 : vector<16x128xf32>
    %105 = arith.mulf %104, %63 : vector<16x128xf32>
    %cst_29 = arith.constant 2.800000e+01 : f32
    %106 = vector.broadcast %cst_29 : f32 to vector<16x128xf32>
    %107 = arith.addf %105, %106 : vector<16x128xf32>
    %108 = arith.mulf %107, %63 : vector<16x128xf32>
    %cst_30 = arith.constant 1.000000e+00 : f32
    %109 = vector.broadcast %cst_30 : f32 to vector<16x128xf32>
    %110 = arith.addf %108, %109 : vector<16x128xf32>
    %111 = arith.divf %88, %110 : vector<16x128xf32>
    %cst_31 = arith.constant 6.500000e+00 : f32
    %112 = vector.broadcast %cst_31 : f32 to vector<16x128xf32>
    %113 = arith.addf %61, %112 : vector<16x128xf32>
    %cst_32 = arith.constant 5.000000e-01 : f32
    %114 = vector.broadcast %cst_32 : f32 to vector<16x128xf32>
    %115 = arith.subf %61, %114 : vector<16x128xf32>
    %116 = math.log %113 : vector<16x128xf32>
    %117 = arith.mulf %115, %116 : vector<16x128xf32>
    %cst_33 = arith.constant 0.918938517 : f32
    %118 = vector.broadcast %cst_33 : f32 to vector<16x128xf32>
    %119 = arith.addf %118, %117 : vector<16x128xf32>
    %120 = arith.subf %119, %113 : vector<16x128xf32>
    %121 = math.log %111 : vector<16x128xf32>
    %122 = arith.addf %120, %121 : vector<16x128xf32>
    %123 = math.log %56 : vector<16x128xf32>
    %124 = arith.subf %122, %123 : vector<16x128xf32>
    %125 = arith.select %58, %124, %122 : vector<16x128xi1>, vector<16x128xf32>
    %126 = arith.addf %52, %54 : vector<8x128xf32>
    %127 = tpu.concatenate %126, %54 in 0 : vector<8x128xf32>, vector<8x128xf32> -> vector<16x128xf32>
    %128 = math.log %127 : vector<16x128xf32>
    %129 = vector.extract_strided_slice %128 {offsets = [0, 0], sizes = [8, 128], strides = [1, 1]} : vector<16x128xf32> to vector<8x128xf32>
    %130 = vector.extract_strided_slice %128 {offsets = [8, 0], sizes = [8, 128], strides = [1, 1]} : vector<16x128xf32> to vector<8x128xf32>
    %131 = vector.extract_strided_slice %125 {offsets = [0, 0], sizes = [8, 128], strides = [1, 1]} : vector<16x128xf32> to vector<8x128xf32>
    %132 = vector.extract_strided_slice %125 {offsets = [8, 0], sizes = [8, 128], strides = [1, 1]} : vector<16x128xf32> to vector<8x128xf32>
    %133 = arith.subf %131, %132 : vector<8x128xf32>
    %134 = arith.mulf %44, %129 : vector<8x128xf32>
    %135 = arith.addf %133, %134 : vector<8x128xf32>
    %136 = arith.mulf %52, %46 : vector<8x128xf32>
    %137 = arith.subf %135, %136 : vector<8x128xf32>
    %138 = arith.mulf %44, %130 : vector<8x128xf32>
    %139 = arith.subf %137, %138 : vector<8x128xf32>
    %140 = arith.mulf %52, %129 : vector<8x128xf32>
    %141 = arith.addf %139, %140 : vector<8x128xf32>
    %cst_34 = arith.constant 0.000000e+00 : f32
    %142 = vector.broadcast %cst_34 : f32 to vector<8x128xf32>
    %143 = arith.subf %142, %42 : vector<8x128xf32>
    %cst_35 = arith.constant 0.000000e+00 : f32
    %144 = vector.broadcast %cst_35 : f32 to vector<8x128xf32>
    %145 = arith.subf %144, %42 : vector<8x128xf32>
    %146 = arith.subf %46, %129 : vector<8x128xf32>
    %147 = arith.mulf %52, %146 : vector<8x128xf32>
    %148 = arith.addf %145, %147 : vector<8x128xf32>
    %149 = tpu.concatenate %143, %148 in 0 : vector<8x128xf32>, vector<8x128xf32> -> vector<16x128xf32>
    %cst_36 = arith.constant 0.000000e+00 : f32
    %150 = vector.broadcast %cst_36 : f32 to vector<16x128xf32>
    %151 = arith.maximumf %149, %150 : vector<16x128xf32>
    %152 = math.absf %149 : vector<16x128xf32>
    %cst_37 = arith.constant 0.000000e+00 : f32
    %153 = vector.broadcast %cst_37 : f32 to vector<16x128xf32>
    %154 = arith.subf %153, %152 : vector<16x128xf32>
    %155 = math.exp %154 : vector<16x128xf32>
    %cst_38 = arith.constant 1.000000e+00 : f32
    %156 = vector.broadcast %cst_38 : f32 to vector<16x128xf32>
    %157 = arith.addf %156, %155 : vector<16x128xf32>
    %158 = math.log %157 : vector<16x128xf32>
    %159 = arith.addf %151, %158 : vector<16x128xf32>
    %160 = vector.extract_strided_slice %159 {offsets = [0, 0], sizes = [8, 128], strides = [1, 1]} : vector<16x128xf32> to vector<8x128xf32>
    %161 = vector.extract_strided_slice %159 {offsets = [8, 0], sizes = [8, 128], strides = [1, 1]} : vector<16x128xf32> to vector<8x128xf32>
    %162 = arith.subf %160, %161 : vector<8x128xf32>
    %163 = arith.addf %42, %160 : vector<8x128xf32>
    %cst_39 = arith.constant 0.000000e+00 : f32
    %164 = vector.broadcast %cst_39 : f32 to vector<8x128xf32>
    %165 = arith.cmpf ogt, %44, %164 : vector<8x128xf32>
    %166 = arith.extui %165 : vector<8x128xi1> to vector<8x128xi32>
    %167 = arith.sitofp %166 : vector<8x128xi32> to vector<8x128xf32>
    %168 = arith.mulf %163, %167 : vector<8x128xf32>
    %cst_40 = arith.constant 1.000000e+00 : f32
    %169 = vector.broadcast %cst_40 : f32 to vector<8x128xf32>
    %170 = arith.subf %169, %167 : vector<8x128xf32>
    %171 = arith.mulf %162, %170 : vector<8x128xf32>
    %c1_i32 = arith.constant 1 : i32
    %172 = arith.muli %arg0, %c1_i32 : i32
    %173 = arith.addi %172, %arg1 : i32
    %c0_i32_41 = arith.constant 0 : i32
    %174 = arith.cmpi eq, %173, %c0_i32_41 : i32
    %175 = arith.extui %174 : i1 to i32
    %c0_i32_42 = arith.constant 0 : i32
    %176 = arith.cmpi ne, %175, %c0_i32_42 : i32
    scf.if %176 {
      %180 = tpu.iota {dimensions = array<i32: 0>} : vector<8x128xi32>
      %181 = tpu.iota {dimensions = array<i32: 1>} : vector<8x128xi32>
      %c1024_i32 = arith.constant 1024 : i32
      %182 = arith.muli %173, %c1024_i32 : i32
      %c128_i32 = arith.constant 128 : i32
      %183 = vector.broadcast %c128_i32 : i32 to vector<8x128xi32>
      %184 = arith.muli %180, %183 : vector<8x128xi32>
      %185 = vector.broadcast %182 : i32 to vector<8x128xi32>
      %186 = arith.addi %185, %184 : vector<8x128xi32>
      %187 = arith.addi %186, %181 : vector<8x128xi32>
      %c16_i32 = arith.constant 16 : i32
      %188 = vector.broadcast %c16_i32 : i32 to vector<8x128xi32>
      %189 = arith.cmpi slt, %187, %188 : vector<8x128xi32>
      %190 = arith.extui %189 : vector<8x128xi1> to vector<8x128xi32>
      %191 = arith.sitofp %190 : vector<8x128xi32> to vector<8x128xf32>
      %192 = arith.mulf %141, %191 : vector<8x128xf32>
      %193 = arith.mulf %168, %191 : vector<8x128xf32>
      %194 = arith.mulf %167, %191 : vector<8x128xf32>
      %195 = arith.mulf %171, %191 : vector<8x128xf32>
      %196 = vector.shape_cast %192 : vector<8x128xf32> to vector<1x8x128xf32>
      %197 = vector.shape_cast %193 : vector<8x128xf32> to vector<1x8x128xf32>
      %198 = vector.shape_cast %194 : vector<8x128xf32> to vector<1x8x128xf32>
      %199 = vector.shape_cast %195 : vector<8x128xf32> to vector<1x8x128xf32>
      %200 = tpu.concatenate %196, %197, %198, %199 in 0 : vector<1x8x128xf32>, vector<1x8x128xf32>, vector<1x8x128xf32>, vector<1x8x128xf32> -> vector<4x8x128xf32>
      %c0_44 = arith.constant 0 : index
      %c0_45 = arith.constant 0 : index
      %c0_46 = arith.constant 0 : index
      %c0_47 = arith.constant 0 : index
      %201 = vector.load %arg6[%c0_44, %c0_45, %c0_46, %c0_47] : memref<1x4x8x128xf32, #tpu.memory_space<vmem>>, vector<1x4x8x128xf32>
      %202 = vector.shape_cast %200 : vector<4x8x128xf32> to vector<1x4x8x128xf32>
      %203 = arith.addf %201, %202 : vector<1x4x8x128xf32>
      %c0_48 = arith.constant 0 : index
      %c0_49 = arith.constant 0 : index
      %c0_50 = arith.constant 0 : index
      %c0_51 = arith.constant 0 : index
      %204 = vector.load %arg6[%c0_48, %c0_49, %c0_50, %c0_51] : memref<1x4x8x128xf32, #tpu.memory_space<vmem>>, vector<1x4x8x128xf32>
      tpu.vector_store %arg6[%c0_48, %c0_49, %c0_50, %c0_51], %203 {strides = array<i32>} : memref<1x4x8x128xf32, #tpu.memory_space<vmem>>, vector<1x4x8x128xf32>,
    } else {
    }
    %true = arith.constant true
    %177 = arith.xori %174, %true : i1
    %178 = arith.extui %177 : i1 to i32
    %c0_i32_43 = arith.constant 0 : i32
    %179 = arith.cmpi ne, %178, %c0_i32_43 : i32
    scf.if %179 {
      %180 = vector.shape_cast %141 : vector<8x128xf32> to vector<1x8x128xf32>
      %181 = vector.shape_cast %168 : vector<8x128xf32> to vector<1x8x128xf32>
      %182 = vector.shape_cast %167 : vector<8x128xf32> to vector<1x8x128xf32>
      %183 = vector.shape_cast %171 : vector<8x128xf32> to vector<1x8x128xf32>
      %184 = tpu.concatenate %180, %181, %182, %183 in 0 : vector<1x8x128xf32>, vector<1x8x128xf32>, vector<1x8x128xf32>, vector<1x8x128xf32> -> vector<4x8x128xf32>
      %c0_44 = arith.constant 0 : index
      %c0_45 = arith.constant 0 : index
      %c0_46 = arith.constant 0 : index
      %c0_47 = arith.constant 0 : index
      %185 = vector.load %arg6[%c0_44, %c0_45, %c0_46, %c0_47] : memref<1x4x8x128xf32, #tpu.memory_space<vmem>>, vector<1x4x8x128xf32>
      %186 = vector.shape_cast %184 : vector<4x8x128xf32> to vector<1x4x8x128xf32>
      %187 = arith.addf %185, %186 : vector<1x4x8x128xf32>
      %c0_48 = arith.constant 0 : index
      %c0_49 = arith.constant 0 : index
      %c0_50 = arith.constant 0 : index
      %c0_51 = arith.constant 0 : index
      %188 = vector.load %arg6[%c0_48, %c0_49, %c0_50, %c0_51] : memref<1x4x8x128xf32, #tpu.memory_space<vmem>>, vector<1x4x8x128xf32>
      tpu.vector_store %arg6[%c0_48, %c0_49, %c0_50, %c0_51], %187 {strides = array<i32>} : memref<1x4x8x128xf32, #tpu.memory_space<vmem>>, vector<1x4x8x128xf32>,
    } else {
    }
    return
  }
  func.func @transform_0(%arg0: i32, %arg1: i32) -> (i32, i32) {
    %c1_i32 = arith.constant 1 : i32
    %0 = arith.muli %arg0, %c1_i32 : i32
    %1 = arith.addi %0, %arg1 : i32
    %c0_i32 = arith.constant 0 : i32
    %c0_i32_0 = arith.constant 0 : i32
    return %1, %c0_i32 : i32, i32
  }
  func.func @transform_1(%arg0: i32, %arg1: i32) -> (i32, i32) {
    %c0_i32 = arith.constant 0 : i32
    %c0_i32_0 = arith.constant 0 : i32
    %c0_i32_1 = arith.constant 0 : i32
    return %c0_i32, %c0_i32_0 : i32, i32
  }
  func.func @transform_2(%arg0: i32, %arg1: i32) -> i32 {
    %c0_i32 = arith.constant 0 : i32
    %c0_i32_0 = arith.constant 0 : i32
    return %c0_i32 : i32
  }
  func.func @transform_3(%arg0: i32, %arg1: i32) -> (i32, i32, i32) {
    %c1_i32 = arith.constant 1 : i32
    %0 = arith.muli %arg0, %c1_i32 : i32
    %1 = arith.addi %0, %arg1 : i32
    %c0_i32 = arith.constant 0 : i32
    %c0_i32_0 = arith.constant 0 : i32
    %c0_i32_1 = arith.constant 0 : i32
    return %1, %c0_i32, %c0_i32_0 : i32, i32, i32
  }
  func.func @transform_4(%arg0: i32, %arg1: i32) -> (i32, i32, i32, i32) {
    %c0_i32 = arith.constant 0 : i32
    %c0_i32_0 = arith.constant 0 : i32
    %c0_i32_1 = arith.constant 0 : i32
    %c0_i32_2 = arith.constant 0 : i32
    return %arg0, %c0_i32, %c0_i32_0, %c0_i32_1 : i32, i32, i32, i32
  }
}

</mosaic_0001>

<bundles_post_ra>
// kernel: tpu_custom_call.1
= control target key start
LH: loop header
LB: loop body
LE: loop exit
PB: predicated region body
PF: predicated region fallthrough
CT: control target
= control target key end

     0   :  { %9 = vsyncpa [#allocation4], 0  ;;  %s3369_s0 = inlined_call_operand.vmem [shape: f32[1024,32], index: 0, kind: input, shape index: {}]   ;;  %s3370_s1 = inlined_call_operand.vmem [shape: f32[32,128], index: 1, kind: input, shape index: {}]   ;;  %s3371_s2 = inlined_call_operand.vmem [shape: f32[3], index: 2, kind: input, shape index: {}]   ;;  %s3372_s3 = inlined_call_operand.vmem [shape: f32[1,8,128], index: 3, kind: input, shape index: {}]   ;;  %s3373_s4 = inlined_call_operand.hbm [shape: f32[1,4,8,128], index: 4, kind: output, shape index: {}]  }
   0x1   :  { %10 = vsyncpa [#allocation3], 0  ;;  %s29_s17 = sshll.u32 %s3371_s2, 4  ;;  %s30_s17 = int_to_ptr.vmem [resolvable:$true] %s29_s17 }
   0x2   :  { %s2395_s18 = scalar_lea.vmem %s30_s17, 16  ;;  %p2400_p1 = scmp.lt.s32.totalorder %s30_s17, %s30_s17 }
   0x3   :  { %p2396_p0 = scmp.ne.s32.totalorder %s30_s17, %s2395_s18  ;;  %p2401_p2 = scmp.lt.s32.totalorder %s2395_s18, %s2395_s18 }
   0x5   :  { %p2402_p3 = por %p2401_p2, %p2400_p1 }
   0x7   :  { %p2403_p4 = pnand %p2402_p3, %p2396_p0 }
   0x9   :  { %2406 = shalt.err (!%p2403_p4)
}
   0xa   :  { %s2433_s19 = smov [#allocation2]  }
   0xb   :  { %32 = dma.vmem_to_smem %s30_s17, 16, %s2433_s19, [#allocation4]  }
   0xc   :  { %2429 = dma.done.wait [#allocation4], 16  }
   0xd   :  { %2430 = vsyncadd [#allocation4], 4294967280 }
   0xe   :  { %44 = sfence }
   0xf   :  { %v206_v0 = vld [vmem:[%s3370_s1] sm:$0xff]  ;;  %v207_v1 = vld [vmem:[%s3370_s1 + $0x8] sm:$0xff]  ;;  %v208_v2 = vld [vmem:[%s3370_s1 + $0x10] sm:$0xff]  ;;  %vm210_vm0 = vcmask 261120   ;;  %vm1577_vm3 = vcmask 1040384   ;;  %vm1579_vm4 = vcmask 1041408  }
  0x10   :  { %v2342_v3 = vpack.c.bf16 %v207_v1, %v206_v0  ;;  %v209_v4 = vld [vmem:[%s3370_s1 + $0x18] sm:$0xff]  ;;  %v78_v5 = vld [vmem:[%s3369_s0] sm:$0xff]  ;;  %v79_v7 = vld [vmem:[%s3369_s0 + $0x8] sm:$0xff]  ;;  %vm1581_vm5 = vcmask 1042432   ;;  %s3244_s5 = sld [smem:[#allocation2 + $0x1]]  ;;  %vm1583_vm6 = vcmask 1043456  }
  0x11   :  { %v2346_v6 = vpack.c.bf16 %v209_v4, %v208_v2  ;;  %2150 = vmatprep.mubr.msk.f32.mxu0 %vm210_vm0, %v78_v5  ;;  %v80_v8 = vld [vmem:[%s3369_s0 + $0x10] sm:$0xff]  ;;  %v142_v9 = vld [vmem:[%s3369_s0 + $0x200] sm:$0xff]  ;;  %v143_v10 = vld [vmem:[%s3369_s0 + $0x208] sm:$0xff]  ;;  %s3246_s6 = sld [smem:[#allocation2 + $0x2]]  ;;  %vm1585_vm7 = vcmask 1044480   ;;  %vm1587_vm8 = vcmask 1045504  }
  0x12   :  { %2343 = vmatprep.subr.bf16.mxu0 %v2342_v3  ;;  %2350 = vmatprep.subr.bf16.mxu1 %v2342_v3  ;;  %v144_v11 = vld [vmem:[%s3369_s0 + $0x210] sm:$0xff]  ;;  %v81_v12 = vld [vmem:[%s3369_s0 + $0x18] sm:$0xff]  ;;  %v82_v14 = vld [vmem:[%s3369_s0 + $0x20] sm:$0xff]  ;;  %vm1589_vm9 = vcmask 1046528   ;;  %s2435_s7 = smov [#allocation5]  }
  0x13   :  { %2345 = vmatpush3.bf16.msra.mxu0 %v2342_v3  ;;  %2352 = vmatpush3.bf16.msra.mxu1 %v2342_v3  ;;  %v145_v13 = vld [vmem:[%s3369_s0 + $0x218] sm:$0xff]  ;;  %v146_v15 = vld [vmem:[%s3369_s0 + $0x220] sm:$0xff]  ;;  %v83_v16 = vld [vmem:[%s3369_s0 + $0x28] sm:$0xff]  ;;  %s1852_s8 = sshll.u32 %s2435_s7, 4  ;;  %s1853_s8 = int_to_ptr.vmem [resolvable:$true] %s1852_s8 }
  0x14   :  { %2347 = vmatprep.subr.bf16.mxu0 %v2346_v6  ;;  %2351 = vmatprep.subr.bf16.mxu1 %v2346_v6  ;;  %v147_v17 = vld [vmem:[%s3369_s0 + $0x228] sm:$0xff]  ;;  %v84_v18 = vld [vmem:[%s3369_s0 + $0x30] sm:$0xff]  ;;  %v85_v20 = vld [vmem:[%s3369_s0 + $0x38] sm:$0xff]  ;;  %s2407_s9 = scalar_lea.vmem %s1853_s8, 512  ;;  %p2412_p6 = scmp.lt.s32.totalorder %s1853_s8, %s1853_s8 }
  0x15   :  { %2246 = vmatprep.mubr.msk.f32.mxu1 %vm210_vm0, %v142_v9  ;;  %v148_v19 = vld [vmem:[%s3369_s0 + $0x230] sm:$0xff]  ;;  %v149_v21 = vld [vmem:[%s3369_s0 + $0x238] sm:$0xff]  ;;  %v86_v22 = vld [vmem:[%s3369_s0 + $0x40] sm:$0xff]  ;;  %p2408_p5 = scmp.ne.s32.totalorder %s1853_s8, %s2407_s9  ;;  %p2413_p7 = scmp.lt.s32.totalorder %s2407_s9, %s2407_s9 }
  0x16   :  { %v150_v23 = vld [vmem:[%s3369_s0 + $0x240] sm:$0xff]  ;;  %v87_v24 = vld [vmem:[%s3369_s0 + $0x48] sm:$0xff]  ;;  %v88_v26 = vld [vmem:[%s3369_s0 + $0x50] sm:$0xff] }
  0x17   :  { %2349 = vmatpush3.bf16.msra.mxu0 %v2346_v6  ;;  %2353 = vmatpush3.bf16.msra.mxu1 %v2346_v6  ;;  %v151_v25 = vld [vmem:[%s3369_s0 + $0x248] sm:$0xff]  ;;  %v152_v27 = vld [vmem:[%s3369_s0 + $0x250] sm:$0xff]  ;;  %v89_v28 = vld [vmem:[%s3369_s0 + $0x58] sm:$0xff]  ;;  %p2414_p8 = por %p2413_p7, %p2412_p6 }
  0x18   :  { %v153_v29 = vld [vmem:[%s3369_s0 + $0x258] sm:$0xff]  ;;  %v90_v30 = vld [vmem:[%s3369_s0 + $0x60] sm:$0xff]  ;;  %v91_v32 = vld [vmem:[%s3369_s0 + $0x68] sm:$0xff] }
  0x19   :  { %v154_v31 = vld [vmem:[%s3369_s0 + $0x260] sm:$0xff]  ;;  %v155_v33 = vld [vmem:[%s3369_s0 + $0x268] sm:$0xff]  ;;  %v92_v34 = vld [vmem:[%s3369_s0 + $0x70] sm:$0xff]  ;;  %p2415_p9 = pnand %p2414_p8, %p2408_p5 }
  0x1a   :  { %2151 = vmatmul.mubr.msk.f32.vlgmr.msra.gmra.mrb[0].mxu0 %vm210_vm0, %v79_v7  ;;  %2247 = vmatmul.mubr.msk.f32.vlgmr.msra.gmra.mrb[0].mxu1 %vm210_vm0, %v143_v10  ;;  %v156_v35 = vld [vmem:[%s3369_s0 + $0x270] sm:$0xff]  ;;  %v93_v36 = vld [vmem:[%s3369_s0 + $0x78] sm:$0xff]  ;;  %v94_v38 = vld [vmem:[%s3369_s0 + $0x80] sm:$0xff] }
  0x1b   :  { %2153 = vmatprep.mubr.msk.f32.mxu0 %vm210_vm0, %v80_v8  ;;  %2249 = vmatprep.mubr.msk.f32.mxu1 %vm210_vm0, %v144_v11  ;;  %v157_v37 = vld [vmem:[%s3369_s0 + $0x278] sm:$0xff]  ;;  %v158_v39 = vld [vmem:[%s3369_s0 + $0x280] sm:$0xff]  ;;  %v95_v40 = vld [vmem:[%s3369_s0 + $0x88] sm:$0xff] }
  0x1c   :  { %v159_v41 = vld [vmem:[%s3369_s0 + $0x288] sm:$0xff]  ;;  %v96_v42 = vld [vmem:[%s3369_s0 + $0x90] sm:$0xff]  ;;  %v97_v44 = vld [vmem:[%s3369_s0 + $0x98] sm:$0xff] }
  0x1d   :  { %v160_v43 = vld [vmem:[%s3369_s0 + $0x290] sm:$0xff]  ;;  %v161_v45 = vld [vmem:[%s3369_s0 + $0x298] sm:$0xff]  ;;  %v98_v46 = vld [vmem:[%s3369_s0 + $0xa0] sm:$0xff] }
  0x1e   :  { %2154 = vmatmul.mubr.msk.f32.gmra.mrb[2].mxu0 %vm210_vm0, %v81_v12  ;;  %2250 = vmatmul.mubr.msk.f32.gmra.mrb[2].mxu1 %vm210_vm0, %v145_v13  ;;  %v162_v47 = vld [vmem:[%s3369_s0 + $0x2a0] sm:$0xff]  ;;  %v99_v48 = vld [vmem:[%s3369_s0 + $0xa8] sm:$0xff]  ;;  %v100_v50 = vld [vmem:[%s3369_s0 + $0xb0] sm:$0xff] }
  0x1f   :  { %2156 = vmatprep.mubr.msk.f32.mxu0 %vm210_vm0, %v82_v14  ;;  %2252 = vmatprep.mubr.msk.f32.mxu1 %vm210_vm0, %v146_v15  ;;  %v163_v49 = vld [vmem:[%s3369_s0 + $0x2a8] sm:$0xff]  ;;  %v164_v51 = vld [vmem:[%s3369_s0 + $0x2b0] sm:$0xff]  ;;  %v101_v52 = vld [vmem:[%s3369_s0 + $0xb8] sm:$0xff] }
  0x20   :  { %v165_v53 = vld [vmem:[%s3369_s0 + $0x2b8] sm:$0xff]  ;;  %v102_v54 = vld [vmem:[%s3369_s0 + $0xc0] sm:$0xff]  ;;  %v103_v56 = vld [vmem:[%s3369_s0 + $0xc8] sm:$0xff] }
  0x21   :  { %v166_v55 = vld [vmem:[%s3369_s0 + $0x2c0] sm:$0xff]  ;;  %v167_v57 = vld [vmem:[%s3369_s0 + $0x2c8] sm:$0xff]  ;;  %v104_v58 = vld [vmem:[%s3369_s0 + $0xd0] sm:$0xff] }
  0x22   :  { %2157 = vmatmul.mubr.msk.f32.gmra.mrb[4].mxu0 %vm210_vm0, %v83_v16  ;;  %2253 = vmatmul.mubr.msk.f32.gmra.mrb[4].mxu1 %vm210_vm0, %v147_v17  ;;  %v168_v59 = vld [vmem:[%s3369_s0 + $0x2d0] sm:$0xff]  ;;  %v105_v60 = vld [vmem:[%s3369_s0 + $0xd8] sm:$0xff]  ;;  %v106_v62 = vld [vmem:[%s3369_s0 + $0xe0] sm:$0xff] }
  0x23   :  { %2159 = vmatprep.mubr.msk.f32.mxu0 %vm210_vm0, %v84_v18  ;;  %2255 = vmatprep.mubr.msk.f32.mxu1 %vm210_vm0, %v148_v19  ;;  %v169_v61 = vld [vmem:[%s3369_s0 + $0x2d8] sm:$0xff]  ;;  %v170_v63 = vld [vmem:[%s3369_s0 + $0x2e0] sm:$0xff]  ;;  %v107_v0 = vld [vmem:[%s3369_s0 + $0xe8] sm:$0xff] }
  0x24   :  { %v171_v1 = vld [vmem:[%s3369_s0 + $0x2e8] sm:$0xff]  ;;  %v108_v2 = vld [vmem:[%s3369_s0 + $0xf0] sm:$0xff]  ;;  %v109_v4 = vld [vmem:[%s3369_s0 + $0xf8] sm:$0xff] }
  0x25   :  { %v172_v3 = vld [vmem:[%s3369_s0 + $0x2f0] sm:$0xff]  ;;  %v173_v5 = vld [vmem:[%s3369_s0 + $0x2f8] sm:$0xff]  ;;  %v110_v6 = vld [vmem:[%s3369_s0 + $0x100] sm:$0xff] }
  0x26   :  { %2160 = vmatmul.mubr.msk.f32.gmra.mrb[6].mxu0 %vm210_vm0, %v85_v20  ;;  %2256 = vmatmul.mubr.msk.f32.gmra.mrb[6].mxu1 %vm210_vm0, %v149_v21  ;;  %v174_v7 = vld [vmem:[%s3369_s0 + $0x300] sm:$0xff]  ;;  %v111_v8 = vld [vmem:[%s3369_s0 + $0x108] sm:$0xff]  ;;  %v112_v10 = vld [vmem:[%s3369_s0 + $0x110] sm:$0xff] }
  0x27   :  { %2162 = vmatprep.mubr.msk.f32.mxu0 %vm210_vm0, %v86_v22  ;;  %2258 = vmatprep.mubr.msk.f32.mxu1 %vm210_vm0, %v150_v23  ;;  %v175_v9 = vld [vmem:[%s3369_s0 + $0x308] sm:$0xff]  ;;  %v176_v11 = vld [vmem:[%s3369_s0 + $0x310] sm:$0xff]  ;;  %v113_v12 = vld [vmem:[%s3369_s0 + $0x118] sm:$0xff] }
  0x28   :  { %v177_v13 = vld [vmem:[%s3369_s0 + $0x318] sm:$0xff]  ;;  %v114_v14 = vld [vmem:[%s3369_s0 + $0x120] sm:$0xff]  ;;  %v115_v16 = vld [vmem:[%s3369_s0 + $0x128] sm:$0xff] }
  0x29   :  { %v178_v15 = vld [vmem:[%s3369_s0 + $0x320] sm:$0xff]  ;;  %v179_v17 = vld [vmem:[%s3369_s0 + $0x328] sm:$0xff]  ;;  %v116_v18 = vld [vmem:[%s3369_s0 + $0x130] sm:$0xff] }
  0x2a   :  { %2163 = vmatmul.mubr.msk.f32.gmra.mrb[8].mxu0 %vm210_vm0, %v87_v24  ;;  %2259 = vmatmul.mubr.msk.f32.gmra.mrb[8].mxu1 %vm210_vm0, %v151_v25  ;;  %v180_v19 = vld [vmem:[%s3369_s0 + $0x330] sm:$0xff]  ;;  %v117_v20 = vld [vmem:[%s3369_s0 + $0x138] sm:$0xff]  ;;  %v118_v22 = vld [vmem:[%s3369_s0 + $0x140] sm:$0xff] }
  0x2b   :  { %2165 = vmatprep.mubr.msk.f32.mxu0 %vm210_vm0, %v88_v26  ;;  %2261 = vmatprep.mubr.msk.f32.mxu1 %vm210_vm0, %v152_v27  ;;  %v181_v21 = vld [vmem:[%s3369_s0 + $0x338] sm:$0xff]  ;;  %v182_v23 = vld [vmem:[%s3369_s0 + $0x340] sm:$0xff]  ;;  %v119_v24 = vld [vmem:[%s3369_s0 + $0x148] sm:$0xff] }
  0x2c   :  { %v183_v25 = vld [vmem:[%s3369_s0 + $0x348] sm:$0xff]  ;;  %v120_v26 = vld [vmem:[%s3369_s0 + $0x150] sm:$0xff] }
  0x2d   :  { %v184_v27 = vld [vmem:[%s3369_s0 + $0x350] sm:$0xff] }
  0x2e   :  { %2166 = vmatmul.mubr.msk.f32.gmra.mrb[10].mxu0 %vm210_vm0, %v89_v28  ;;  %2262 = vmatmul.mubr.msk.f32.gmra.mrb[10].mxu1 %vm210_vm0, %v153_v29  ;;  %v121_v28 = vld [vmem:[%s3369_s0 + $0x158] sm:$0xff]  ;;  %v122_v29 = vld [vmem:[%s3369_s0 + $0x160] sm:$0xff] }
  0x2f   :  { %2168 = vmatprep.mubr.msk.f32.mxu0 %vm210_vm0, %v90_v30  ;;  %2264 = vmatprep.mubr.msk.f32.mxu1 %vm210_vm0, %v154_v31  ;;  %v185_v30 = vld [vmem:[%s3369_s0 + $0x358] sm:$0xff]  ;;  %v123_v31 = vld [vmem:[%s3369_s0 + $0x168] sm:$0xff] }
  0x32   :  { %2169 = vmatmul.mubr.msk.f32.gmra.mrb[12].mxu0 %vm210_vm0, %v91_v32  ;;  %2265 = vmatmul.mubr.msk.f32.gmra.mrb[12].mxu1 %vm210_vm0, %v155_v33  ;;  %v186_v32 = vld [vmem:[%s3369_s0 + $0x360] sm:$0xff]  ;;  %v124_v33 = vld [vmem:[%s3369_s0 + $0x170] sm:$0xff] }
  0x33   :  { %2171 = vmatprep.mubr.msk.f32.mxu0 %vm210_vm0, %v92_v34  ;;  %2267 = vmatprep.mubr.msk.f32.mxu1 %vm210_vm0, %v156_v35  ;;  %v187_v34 = vld [vmem:[%s3369_s0 + $0x368] sm:$0xff]  ;;  %v125_v35 = vld [vmem:[%s3369_s0 + $0x178] sm:$0xff] }
  0x36   :  { %2172 = vmatmul.mubr.msk.f32.gmra.mrb[14].mxu0 %vm210_vm0, %v93_v36  ;;  %2268 = vmatmul.mubr.msk.f32.gmra.mrb[14].mxu1 %vm210_vm0, %v157_v37  ;;  %v188_v36 = vld [vmem:[%s3369_s0 + $0x370] sm:$0xff]  ;;  %v126_v37 = vld [vmem:[%s3369_s0 + $0x180] sm:$0xff] }
  0x37   :  { %2174 = vmatprep.mubr.msk.f32.mxu0 %vm210_vm0, %v94_v38  ;;  %2270 = vmatprep.mubr.msk.f32.mxu1 %vm210_vm0, %v158_v39  ;;  %v189_v38 = vld [vmem:[%s3369_s0 + $0x378] sm:$0xff]  ;;  %v127_v39 = vld [vmem:[%s3369_s0 + $0x188] sm:$0xff] }
  0x3a   :  { %2175 = vmatmul.mubr.msk.f32.gmra.mrb[16].mxu0 %vm210_vm0, %v95_v40  ;;  %2271 = vmatmul.mubr.msk.f32.gmra.mrb[16].mxu1 %vm210_vm0, %v159_v41  ;;  %v190_v40 = vld [vmem:[%s3369_s0 + $0x380] sm:$0xff]  ;;  %v128_v41 = vld [vmem:[%s3369_s0 + $0x190] sm:$0xff] }
  0x3b   :  { %2177 = vmatprep.mubr.msk.f32.mxu0 %vm210_vm0, %v96_v42  ;;  %2273 = vmatprep.mubr.msk.f32.mxu1 %vm210_vm0, %v160_v43  ;;  %v191_v42 = vld [vmem:[%s3369_s0 + $0x388] sm:$0xff]  ;;  %v129_v43 = vld [vmem:[%s3369_s0 + $0x198] sm:$0xff] }
  0x3e   :  { %2178 = vmatmul.mubr.msk.f32.gmra.mrb[18].mxu0 %vm210_vm0, %v97_v44  ;;  %2274 = vmatmul.mubr.msk.f32.gmra.mrb[18].mxu1 %vm210_vm0, %v161_v45  ;;  %v130_v44 = vld [vmem:[%s3369_s0 + $0x1a0] sm:$0xff]  ;;  %v131_v45 = vld [vmem:[%s3369_s0 + $0x1a8] sm:$0xff] }
  0x3f   :  { %2180 = vmatprep.mubr.msk.f32.mxu0 %vm210_vm0, %v98_v46  ;;  %2276 = vmatprep.mubr.msk.f32.mxu1 %vm210_vm0, %v162_v47  ;;  %v192_v46 = vld [vmem:[%s3369_s0 + $0x390] sm:$0xff] }
  0x40   :  { %v132_v47 = vld [vmem:[%s3369_s0 + $0x1b0] sm:$0xff] }
  0x42   :  { %2181 = vmatmul.mubr.msk.f32.gmra.mrb[20].mxu0 %vm210_vm0, %v99_v48  ;;  %2277 = vmatmul.mubr.msk.f32.gmra.mrb[20].mxu1 %vm210_vm0, %v163_v49  ;;  %v193_v48 = vld [vmem:[%s3369_s0 + $0x398] sm:$0xff] }
  0x43   :  { %2183 = vmatprep.mubr.msk.f32.mxu0 %vm210_vm0, %v100_v50  ;;  %2279 = vmatprep.mubr.msk.f32.mxu1 %vm210_vm0, %v164_v51  ;;  %v133_v49 = vld [vmem:[%s3369_s0 + $0x1b8] sm:$0xff]  ;;  %v134_v50 = vld [vmem:[%s3369_s0 + $0x1c0] sm:$0xff]  ;;  %v135_v51 = vld [vmem:[%s3369_s0 + $0x1c8] sm:$0xff] }
  0x46   :  { %2184 = vmatmul.mubr.msk.f32.gmra.mrb[22].mxu0 %vm210_vm0, %v101_v52  ;;  %2280 = vmatmul.mubr.msk.f32.gmra.mrb[22].mxu1 %vm210_vm0, %v165_v53  ;;  %v194_v52 = vld [vmem:[%s3369_s0 + $0x3a0] sm:$0xff]  ;;  %v136_v53 = vld [vmem:[%s3369_s0 + $0x1d0] sm:$0xff] }
  0x47   :  { %2186 = vmatprep.mubr.msk.f32.mxu0 %vm210_vm0, %v102_v54  ;;  %2282 = vmatprep.mubr.msk.f32.mxu1 %vm210_vm0, %v166_v55  ;;  %v195_v54 = vld [vmem:[%s3369_s0 + $0x3a8] sm:$0xff]  ;;  %v137_v55 = vld [vmem:[%s3369_s0 + $0x1d8] sm:$0xff] }
  0x4a   :  { %2187 = vmatmul.mubr.msk.f32.gmra.mrb[24].mxu0 %vm210_vm0, %v103_v56  ;;  %2283 = vmatmul.mubr.msk.f32.gmra.mrb[24].mxu1 %vm210_vm0, %v167_v57  ;;  %v138_v56 = vld [vmem:[%s3369_s0 + $0x1e0] sm:$0xff]  ;;  %v139_v57 = vld [vmem:[%s3369_s0 + $0x1e8] sm:$0xff] }
  0x4b   :  { %2189 = vmatprep.mubr.msk.f32.mxu0 %vm210_vm0, %v104_v58  ;;  %2285 = vmatprep.mubr.msk.f32.mxu1 %vm210_vm0, %v168_v59  ;;  %v196_v58 = vld [vmem:[%s3369_s0 + $0x3b0] sm:$0xff]  ;;  %v197_v59 = vld [vmem:[%s3369_s0 + $0x3b8] sm:$0xff] }
  0x4e   :  { %2190 = vmatmul.mubr.msk.f32.gmra.mrb[26].mxu0 %vm210_vm0, %v105_v60  ;;  %2286 = vmatmul.mubr.msk.f32.gmra.mrb[26].mxu1 %vm210_vm0, %v169_v61  ;;  %v140_v60 = vld [vmem:[%s3369_s0 + $0x1f0] sm:$0xff]  ;;  %v141_v61 = vld [vmem:[%s3369_s0 + $0x1f8] sm:$0xff] }
  0x4f   :  { %2192 = vmatprep.mubr.msk.f32.mxu0 %vm210_vm0, %v106_v62  ;;  %2288 = vmatprep.mubr.msk.f32.mxu1 %vm210_vm0, %v170_v63  ;;  %v198_v62 = vld [vmem:[%s3369_s0 + $0x3c0] sm:$0xff]  ;;  %v199_v63 = vld [vmem:[%s3369_s0 + $0x3c8] sm:$0xff] }
  0x52   :  { %2193 = vmatmul.mubr.msk.f32.gmra.mrb[28].mxu0 %vm210_vm0, %v107_v0  ;;  %2289 = vmatmul.mubr.msk.f32.gmra.mrb[28].mxu1 %vm210_vm0, %v171_v1  ;;  %v200_v0 = vld [vmem:[%s3369_s0 + $0x3d0] sm:$0xff]  ;;  %v201_v1 = vld [vmem:[%s3369_s0 + $0x3d8] sm:$0xff] }
  0x53   :  { %2195 = vmatprep.mubr.msk.f32.mxu0 %vm210_vm0, %v108_v2  ;;  %2291 = vmatprep.mubr.msk.f32.mxu1 %vm210_vm0, %v172_v3  ;;  %v202_v2 = vld [vmem:[%s3369_s0 + $0x3e0] sm:$0xff]  ;;  %v203_v3 = vld [vmem:[%s3369_s0 + $0x3e8] sm:$0xff] }
  0x56   :  { %2196 = vmatmul.mubr.msk.f32.gmra.mrb[30].mxu0 %vm210_vm0, %v109_v4  ;;  %2292 = vmatmul.mubr.msk.f32.gmra.mrb[30].mxu1 %vm210_vm0, %v173_v5  ;;  %v204_v4 = vld [vmem:[%s3369_s0 + $0x3f0] sm:$0xff]  ;;  %v205_v5 = vld [vmem:[%s3369_s0 + $0x3f8] sm:$0xff] }
  0x57   :  { %2198 = vmatprep.mubr.msk.f32.mxu0 %vm210_vm0, %v110_v6  ;;  %2294 = vmatprep.mubr.msk.f32.mxu1 %vm210_vm0, %v174_v7 }
  0x5a   :  { %2199 = vmatmul.mubr.msk.f32.gmra.mrb[32].mxu0 %vm210_vm0, %v111_v8  ;;  %2295 = vmatmul.mubr.msk.f32.gmra.mrb[32].mxu1 %vm210_vm0, %v175_v9 }
  0x5b   :  { %2201 = vmatprep.mubr.msk.f32.mxu0 %vm210_vm0, %v112_v10  ;;  %2297 = vmatprep.mubr.msk.f32.mxu1 %vm210_vm0, %v176_v11 }
  0x5e   :  { %2202 = vmatmul.mubr.msk.f32.gmra.mrb[34].mxu0 %vm210_vm0, %v113_v12  ;;  %2298 = vmatmul.mubr.msk.f32.gmra.mrb[34].mxu1 %vm210_vm0, %v177_v13 }
  0x5f   :  { %2204 = vmatprep.mubr.msk.f32.mxu0 %vm210_vm0, %v114_v14  ;;  %2300 = vmatprep.mubr.msk.f32.mxu1 %vm210_vm0, %v178_v15 }
  0x62   :  { %2205 = vmatmul.mubr.msk.f32.gmra.mrb[36].mxu0 %vm210_vm0, %v115_v16  ;;  %2301 = vmatmul.mubr.msk.f32.gmra.mrb[36].mxu1 %vm210_vm0, %v179_v17 }
  0x63   :  { %2207 = vmatprep.mubr.msk.f32.mxu0 %vm210_vm0, %v116_v18  ;;  %2303 = vmatprep.mubr.msk.f32.mxu1 %vm210_vm0, %v180_v19 }
  0x66   :  { %2208 = vmatmul.mubr.msk.f32.gmra.mrb[38].mxu0 %vm210_vm0, %v117_v20  ;;  %2304 = vmatmul.mubr.msk.f32.gmra.mrb[38].mxu1 %vm210_vm0, %v181_v21 }
  0x67   :  { %2210 = vmatprep.mubr.msk.f32.mxu0 %vm210_vm0, %v118_v22  ;;  %2306 = vmatprep.mubr.msk.f32.mxu1 %vm210_vm0, %v182_v23 }
  0x6a   :  { %2211 = vmatmul.mubr.msk.f32.gmra.mrb[40].mxu0 %vm210_vm0, %v119_v24  ;;  %2307 = vmatmul.mubr.msk.f32.gmra.mrb[40].mxu1 %vm210_vm0, %v183_v25 }
  0x6b   :  { %2213 = vmatprep.mubr.msk.f32.mxu0 %vm210_vm0, %v120_v26  ;;  %2309 = vmatprep.mubr.msk.f32.mxu1 %vm210_vm0, %v184_v27 }
  0x6e   :  { %2214 = vmatmul.mubr.msk.f32.gmra.mrb[42].mxu0 %vm210_vm0, %v121_v28  ;;  %2310 = vmatmul.mubr.msk.f32.gmra.mrb[42].mxu1 %vm210_vm0, %v185_v30 }
  0x6f   :  { %2216 = vmatprep.mubr.msk.f32.mxu0 %vm210_vm0, %v122_v29  ;;  %2312 = vmatprep.mubr.msk.f32.mxu1 %vm210_vm0, %v186_v32 }
  0x72   :  { %2217 = vmatmul.mubr.msk.f32.gmra.mrb[44].mxu0 %vm210_vm0, %v123_v31  ;;  %2313 = vmatmul.mubr.msk.f32.gmra.mrb[44].mxu1 %vm210_vm0, %v187_v34 }
  0x73   :  { %2219 = vmatprep.mubr.msk.f32.mxu0 %vm210_vm0, %v124_v33  ;;  %2315 = vmatprep.mubr.msk.f32.mxu1 %vm210_vm0, %v188_v36 }
  0x76   :  { %2220 = vmatmul.mubr.msk.f32.gmra.mrb[46].mxu0 %vm210_vm0, %v125_v35  ;;  %2316 = vmatmul.mubr.msk.f32.gmra.mrb[46].mxu1 %vm210_vm0, %v189_v38 }
  0x77   :  { %2222 = vmatprep.mubr.msk.f32.mxu0 %vm210_vm0, %v126_v37  ;;  %2318 = vmatprep.mubr.msk.f32.mxu1 %vm210_vm0, %v190_v40 }
  0x7a   :  { %2223 = vmatmul.mubr.msk.f32.gmra.mrb[48].mxu0 %vm210_vm0, %v127_v39  ;;  %2319 = vmatmul.mubr.msk.f32.gmra.mrb[48].mxu1 %vm210_vm0, %v191_v42 }
  0x7b   :  { %2225 = vmatprep.mubr.msk.f32.mxu0 %vm210_vm0, %v128_v41  ;;  %2321 = vmatprep.mubr.msk.f32.mxu1 %vm210_vm0, %v192_v46 }
  0x7e   :  { %2226 = vmatmul.mubr.msk.f32.gmra.mrb[50].mxu0 %vm210_vm0, %v129_v43  ;;  %2322 = vmatmul.mubr.msk.f32.gmra.mrb[50].mxu1 %vm210_vm0, %v193_v48 }
  0x7f   :  { %2228 = vmatprep.mubr.msk.f32.mxu0 %vm210_vm0, %v130_v44  ;;  %2324 = vmatprep.mubr.msk.f32.mxu1 %vm210_vm0, %v194_v52 }
  0x82   :  { %2229 = vmatmul.mubr.msk.f32.gmra.mrb[52].mxu0 %vm210_vm0, %v131_v45  ;;  %2325 = vmatmul.mubr.msk.f32.gmra.mrb[52].mxu1 %vm210_vm0, %v195_v54 }
  0x83   :  { %2231 = vmatprep.mubr.msk.f32.mxu0 %vm210_vm0, %v132_v47  ;;  %2327 = vmatprep.mubr.msk.f32.mxu1 %vm210_vm0, %v196_v58 }
  0x86   :  { %2232 = vmatmul.mubr.msk.f32.gmra.mrb[54].mxu0 %vm210_vm0, %v133_v49  ;;  %2328 = vmatmul.mubr.msk.f32.gmra.mrb[54].mxu1 %vm210_vm0, %v197_v59 }
  0x87   :  { %2234 = vmatprep.mubr.msk.f32.mxu0 %vm210_vm0, %v134_v50  ;;  %2330 = vmatprep.mubr.msk.f32.mxu1 %vm210_vm0, %v198_v62 }
  0x8a   :  { %2235 = vmatmul.mubr.msk.f32.gmra.mrb[56].mxu0 %vm210_vm0, %v135_v51  ;;  %2331 = vmatmul.mubr.msk.f32.gmra.mrb[56].mxu1 %vm210_vm0, %v199_v63 }
  0x8b   :  { %2237 = vmatprep.mubr.msk.f32.mxu0 %vm210_vm0, %v136_v53  ;;  %2333 = vmatprep.mubr.msk.f32.mxu1 %vm210_vm0, %v200_v0 }
  0x8e   :  { %2238 = vmatmul.mubr.msk.f32.gmra.mrb[58].mxu0 %vm210_vm0, %v137_v55  ;;  %2334 = vmatmul.mubr.msk.f32.gmra.mrb[58].mxu1 %vm210_vm0, %v201_v1 }
  0x8f   :  { %2240 = vmatprep.mubr.msk.f32.mxu0 %vm210_vm0, %v138_v56  ;;  %2336 = vmatprep.mubr.msk.f32.mxu1 %vm210_vm0, %v202_v2 }
  0x92   :  { %2241 = vmatmul.mubr.msk.f32.gmra.mrb[60].mxu0 %vm210_vm0, %v139_v57  ;;  %2337 = vmatmul.mubr.msk.f32.gmra.mrb[60].mxu1 %vm210_vm0, %v203_v3 }
  0x93   :  { %2243 = vmatprep.mubr.msk.f32.mxu0 %vm210_vm0, %v140_v60  ;;  %2339 = vmatprep.mubr.msk.f32.mxu1 %vm210_vm0, %v204_v4 }
  0x96   :  { %2244 = vmatmul.mubr.msk.f32.gmra.mrb[62].mxu0 %vm210_vm0, %v141_v61  ;;  %2340 = vmatmul.mubr.msk.f32.gmra.mrb[62].mxu1 %vm210_vm0, %v205_v5 }
  0xed   :  { %v2152_v6 = vpop.f32.mrb[0].mxu0  ;;  %v2990_v7 = vpop.f32.mrb[0].mxu1 }
  0xee   :  { %v661_v8 = vpop.f32.mrb[1].mxu0  ;;  %v2992_v9 = vpop.f32.mrb[1].mxu1 }
  0xef   :  { %1300 = vxpose.xlu0.b32.start [1/16] (narrow) %v661_v8, 8 }
  0xf1   :  { %v2155_v10 = vpop.f32.mrb[2].mxu0  ;;  %v2994_v11 = vpop.f32.mrb[2].mxu1 }
  0xf2   :  { %v671_v12 = vpop.f32.mrb[3].mxu0  ;;  %v2996_v13 = vpop.f32.mrb[3].mxu1 }
  0xf3   :  { %1301 = vxpose.xlu0.b32.cont [2/16] (narrow) %v2152_v6, 8 }
  0xf5   :  { %v2158_v14 = vpop.f32.mrb[4].mxu0  ;;  %v2998_v15 = vpop.f32.mrb[4].mxu1 }
  0xf6   :  { %v681_v16 = vpop.f32.mrb[5].mxu0  ;;  %v3000_v17 = vpop.f32.mrb[5].mxu1 }
  0xf7   :  { %1302 = vxpose.xlu0.b32.cont [3/16] (narrow) %v671_v12, 8 }
  0xf9   :  { %v2161_v18 = vpop.f32.mrb[6].mxu0  ;;  %v3002_v19 = vpop.f32.mrb[6].mxu1 }
  0xfa   :  { %v691_v20 = vpop.f32.mrb[7].mxu0  ;;  %v3004_v21 = vpop.f32.mrb[7].mxu1 }
  0xfb   :  { %1303 = vxpose.xlu0.b32.cont [4/16] (narrow) %v2155_v10, 8 }
  0xfd   :  { %v2164_v22 = vpop.f32.mrb[8].mxu0  ;;  %v3006_v23 = vpop.f32.mrb[8].mxu1 }
  0xfe   :  { %v701_v24 = vpop.f32.mrb[9].mxu0  ;;  %v3008_v25 = vpop.f32.mrb[9].mxu1 }
  0xff   :  { %1304 = vxpose.xlu0.b32.cont [5/16] (narrow) %v681_v16, 8 }
 0x101   :  { %v2167_v26 = vpop.f32.mrb[10].mxu0  ;;  %v3010_v27 = vpop.f32.mrb[10].mxu1 }
 0x102   :  { %v711_v28 = vpop.f32.mrb[11].mxu0  ;;  %v3012_v29 = vpop.f32.mrb[11].mxu1 }
 0x103   :  { %1305 = vxpose.xlu0.b32.cont [6/16] (narrow) %v2158_v14, 8 }
 0x105   :  { %v2170_v30 = vpop.f32.mrb[12].mxu0  ;;  %v3014_v31 = vpop.f32.mrb[12].mxu1 }
 0x106   :  { %v721_v32 = vpop.f32.mrb[13].mxu0  ;;  %v3016_v33 = vpop.f32.mrb[13].mxu1 }
 0x107   :  { %1306 = vxpose.xlu0.b32.cont [7/16] (narrow) %v691_v20, 8 }
 0x109   :  { %v2173_v34 = vpop.f32.mrb[14].mxu0  ;;  %v3018_v35 = vpop.f32.mrb[14].mxu1 }
 0x10a   :  { %v731_v36 = vpop.f32.mrb[15].mxu0  ;;  %v3020_v37 = vpop.f32.mrb[15].mxu1 }
 0x10b   :  { %1307 = vxpose.xlu0.b32.cont [8/16] (narrow) %v2161_v18, 8 }
 0x10d   :  { %v2176_v38 = vpop.f32.mrb[16].mxu0  ;;  %v3022_v39 = vpop.f32.mrb[16].mxu1 }
 0x10e   :  { %v741_v40 = vpop.f32.mrb[17].mxu0  ;;  %v3024_v41 = vpop.f32.mrb[17].mxu1 }
 0x10f   :  { %1308 = vxpose.xlu0.b32.cont [9/16] (narrow) %v701_v24, 8  ;;  %1332 = vxpose.xlu1.b32.start [1/16] (narrow) %v741_v40, 8 }
 0x111   :  { %v2179_v42 = vpop.f32.mrb[18].mxu0  ;;  %v3026_v43 = vpop.f32.mrb[18].mxu1 }
 0x112   :  { %v751_v44 = vpop.f32.mrb[19].mxu0  ;;  %v3028_v45 = vpop.f32.mrb[19].mxu1 }
 0x113   :  { %1309 = vxpose.xlu0.b32.cont [10/16] (narrow) %v2164_v22, 8  ;;  %1333 = vxpose.xlu1.b32.cont [2/16] (narrow) %v2176_v38, 8 }
 0x115   :  { %v2182_v46 = vpop.f32.mrb[20].mxu0  ;;  %v3030_v47 = vpop.f32.mrb[20].mxu1 }
 0x116   :  { %v761_v48 = vpop.f32.mrb[21].mxu0  ;;  %v3032_v49 = vpop.f32.mrb[21].mxu1 }
 0x117   :  { %1310 = vxpose.xlu0.b32.cont [11/16] (narrow) %v711_v28, 8  ;;  %1334 = vxpose.xlu1.b32.cont [3/16] (narrow) %v751_v44, 8 }
 0x119   :  { %v2185_v50 = vpop.f32.mrb[22].mxu0  ;;  %v3034_v51 = vpop.f32.mrb[22].mxu1 }
 0x11a   :  { %v771_v52 = vpop.f32.mrb[23].mxu0  ;;  %v3036_v53 = vpop.f32.mrb[23].mxu1 }
 0x11b   :  { %1311 = vxpose.xlu0.b32.cont [12/16] (narrow) %v2167_v26, 8  ;;  %1335 = vxpose.xlu1.b32.cont [4/16] (narrow) %v2179_v42, 8 }
 0x11d   :  { %v2188_v54 = vpop.f32.mrb[24].mxu0  ;;  %v3038_v55 = vpop.f32.mrb[24].mxu1 }
 0x11e   :  { %v781_v56 = vpop.f32.mrb[25].mxu0  ;;  %v3040_v57 = vpop.f32.mrb[25].mxu1 }
 0x11f   :  { %1312 = vxpose.xlu0.b32.cont [13/16] (narrow) %v721_v32, 8  ;;  %1336 = vxpose.xlu1.b32.cont [5/16] (narrow) %v761_v48, 8 }
 0x121   :  { %v2191_v58 = vpop.f32.mrb[26].mxu0  ;;  %v3042_v59 = vpop.f32.mrb[26].mxu1 }
 0x122   :  { %v791_v60 = vpop.f32.mrb[27].mxu0  ;;  %v3044_v61 = vpop.f32.mrb[27].mxu1 }
 0x123   :  { %1313 = vxpose.xlu0.b32.cont [14/16] (narrow) %v2170_v30, 8  ;;  %1337 = vxpose.xlu1.b32.cont [6/16] (narrow) %v2182_v46, 8 }
 0x125   :  { %v2194_v62 = vpop.f32.mrb[28].mxu0  ;;  %v3046_v63 = vpop.f32.mrb[28].mxu1 }
 0x126   :  { %v801_v0 = vpop.f32.mrb[29].mxu0  ;;  %v3048_v1 = vpop.f32.mrb[29].mxu1 }
 0x127   :  { %1314 = vxpose.xlu0.b32.cont [15/16] (narrow) %v731_v36, 8  ;;  %1338 = vxpose.xlu1.b32.cont [7/16] (narrow) %v771_v52, 8 }
 0x129   :  { %v2197_v2 = vpop.f32.mrb[30].mxu0  ;;  %v3050_v3 = vpop.f32.mrb[30].mxu1 }
 0x12a   :  { %v811_v4 = vpop.f32.mrb[31].mxu0  ;;  %v3052_v5 = vpop.f32.mrb[31].mxu1 }
 0x12b   :  { %1315 = vxpose.xlu0.b32.end [16/16] (narrow) %v2173_v34, 8  ;;  %1339 = vxpose.xlu1.b32.cont [8/16] (narrow) %v2185_v50, 8 }
 0x12d   :  { %v3054_v6 = vpop.f32.mrb[32].mxu0  ;;  %v3056_v8 = vpop.f32.mrb[32].mxu1 }
 0x12e   :  { %v3058_v10 = vpop.f32.mrb[33].mxu0  ;;  %v3060_v12 = vpop.f32.mrb[33].mxu1 }
 0x12f   :  { %1428 = vxpose.xlu0.b32.start [1/16] (narrow) %v2992_v9, 8  ;;  %1340 = vxpose.xlu1.b32.cont [9/16] (narrow) %v781_v56, 8 }
 0x131   :  { %v3063_v14 = vpop.f32.mrb[34].mxu0  ;;  %v3065_v16 = vpop.f32.mrb[34].mxu1 }
 0x132   :  { %v3067_v18 = vpop.f32.mrb[35].mxu0  ;;  %v3069_v20 = vpop.f32.mrb[35].mxu1 }
 0x133   :  { %1429 = vxpose.xlu0.b32.cont [2/16] (narrow) %v2990_v7, 8  ;;  %1341 = vxpose.xlu1.b32.cont [10/16] (narrow) %v2188_v54, 8 }
 0x135   :  { %v3072_v22 = vpop.f32.mrb[36].mxu0  ;;  %v3074_v24 = vpop.f32.mrb[36].mxu1 }
 0x136   :  { %v3076_v26 = vpop.f32.mrb[37].mxu0  ;;  %v3078_v28 = vpop.f32.mrb[37].mxu1 }
 0x137   :  { %1430 = vxpose.xlu0.b32.cont [3/16] (narrow) %v2996_v13, 8  ;;  %1342 = vxpose.xlu1.b32.cont [11/16] (narrow) %v791_v60, 8 }
 0x139   :  { %v3081_v9 = vpop.f32.mrb[38].mxu0  ;;  %v3083_v30 = vpop.f32.mrb[38].mxu1 }
 0x13a   :  { %v3085_v32 = vpop.f32.mrb[39].mxu0  ;;  %v3087_v34 = vpop.f32.mrb[39].mxu1 }
 0x13b   :  { %1431 = vxpose.xlu0.b32.cont [4/16] (narrow) %v2994_v11, 8  ;;  %1343 = vxpose.xlu1.b32.cont [12/16] (narrow) %v2191_v58, 8 }
 0x13d   :  { %v3090_v7 = vpop.f32.mrb[40].mxu0  ;;  %v3092_v36 = vpop.f32.mrb[40].mxu1 }
 0x13e   :  { %v3094_v38 = vpop.f32.mrb[41].mxu0  ;;  %v3096_v40 = vpop.f32.mrb[41].mxu1 }
 0x13f   :  { %1432 = vxpose.xlu0.b32.cont [5/16] (narrow) %v3000_v17, 8  ;;  %1344 = vxpose.xlu1.b32.cont [13/16] (narrow) %v801_v0, 8 }
 0x141   :  { %v3099_v13 = vpop.f32.mrb[42].mxu0  ;;  %v3101_v42 = vpop.f32.mrb[42].mxu1 }
 0x142   :  { %v3103_v44 = vpop.f32.mrb[43].mxu0  ;;  %v3105_v46 = vpop.f32.mrb[43].mxu1 }
 0x143   :  { %1433 = vxpose.xlu0.b32.cont [6/16] (narrow) %v2998_v15, 8  ;;  %1345 = vxpose.xlu1.b32.cont [14/16] (narrow) %v2194_v62, 8 }
 0x145   :  { %v3108_v11 = vpop.f32.mrb[44].mxu0  ;;  %v3110_v48 = vpop.f32.mrb[44].mxu1 }
 0x146   :  { %3374 = vst [vmem:[#allocation8_spill] sm:$0xff] %v3110_v48  ;;  %v3112_v50 = vpop.f32.mrb[45].mxu0  ;;  %v3114_v52 = vpop.f32.mrb[45].mxu1 }
 0x147   :  { %3375 = vst [vmem:[#allocation9_spill] sm:$0xff] %v3114_v52  ;;  %1434 = vxpose.xlu0.b32.cont [7/16] (narrow) %v3004_v21, 8  ;;  %1346 = vxpose.xlu1.b32.cont [15/16] (narrow) %v811_v4, 8 }
 0x149   :  { %v3117_v17 = vpop.f32.mrb[46].mxu0  ;;  %v3119_v54 = vpop.f32.mrb[46].mxu1 }
 0x14a   :  { %3376 = vst [vmem:[#allocation10_spill] sm:$0xff] %v3119_v54  ;;  %v3121_v56 = vpop.f32.mrb[47].mxu0  ;;  %v3123_v58 = vpop.f32.mrb[47].mxu1 }
 0x14b   :  { %3377 = vst [vmem:[#allocation11_spill] sm:$0xff] %v3123_v58  ;;  %1435 = vxpose.xlu0.b32.cont [8/16] (narrow) %v3002_v19, 8  ;;  %1347 = vxpose.xlu1.b32.end [16/16] (narrow) %v2197_v2, 8 }
 0x14d   :  { %v3126_v15 = vpop.f32.mrb[48].mxu0  ;;  %v3128_v60 = vpop.f32.mrb[48].mxu1 }
 0x14e   :  { %v901_v62 = vpop.f32.mrb[49].mxu0  ;;  %v3130_v0 = vpop.f32.mrb[49].mxu1 }
 0x14f   :  { %1436 = vxpose.xlu0.b32.cont [9/16] (narrow) %v3008_v25, 8  ;;  %1460 = vxpose.xlu1.b32.start [1/16] (narrow) %v3024_v41, 8 }
 0x151   :  { %v3134_v21 = vpop.f32.mrb[50].mxu0  ;;  %v3138_v19 = vpop.f32.mrb[50].mxu1 }
 0x152   :  { %v911_v4 = vpop.f32.mrb[51].mxu0  ;;  %3378 = vst [vmem:[#allocation12_spill] sm:$0xff] %v3138_v19  ;;  %v3142_v54 = vpop.f32.mrb[51].mxu1 }
 0x153   :  { %1437 = vxpose.xlu0.b32.cont [10/16] (narrow) %v3006_v23, 8  ;;  %1461 = vxpose.xlu1.b32.cont [2/16] (narrow) %v3022_v39, 8 }
 0x155   :  { %v3140_v2 = vpop.f32.mrb[52].mxu0  ;;  %v3148_v23 = vpop.f32.mrb[52].mxu1 }
 0x156   :  { %v921_v58 = vpop.f32.mrb[53].mxu0  ;;  %3379 = vst [vmem:[#allocation13_spill] sm:$0xff] %v3148_v23  ;;  %v3150_v48 = vpop.f32.mrb[53].mxu1 }
 0x157   :  { %1438 = vxpose.xlu0.b32.cont [11/16] (narrow) %v3012_v29, 8  ;;  %1462 = vxpose.xlu1.b32.cont [3/16] (narrow) %v3028_v45, 8  ;;  %3380 = vst [vmem:[#allocation14_spill] sm:$0xff] %v3150_v48 }
 0x159   :  { %v2233_v25 = vpop.f32.mrb[54].mxu0  ;;  %v3156_v45 = vpop.f32.mrb[54].mxu1 }
 0x15a   :  { %v931_v41 = vpop.f32.mrb[55].mxu0 }
 0x15b   :  { %1439 = vxpose.xlu0.b32.cont [12/16] (narrow) %v3010_v27, 8  ;;  %1463 = vxpose.xlu1.b32.cont [4/16] (narrow) %v3026_v43, 8  ;;  %v3158_v43 = vpop.f32.mrb[55].mxu1 }
 0x15d   :  { %v2236_v39 = vpop.f32.mrb[56].mxu0 }
 0x15e   :  { %v941_v52 = vpop.f32.mrb[57].mxu0 }
 0x15f   :  { %1440 = vxpose.xlu0.b32.cont [13/16] (narrow) %v3016_v33, 8  ;;  %1464 = vxpose.xlu1.b32.cont [5/16] (narrow) %v3032_v49, 8  ;;  %v3164_v49 = vpop.f32.mrb[56].mxu1 }
 0x161   :  { %v2239_v19 = vpop.f32.mrb[58].mxu0 }
 0x162   :  { %v951_v29 = vpop.f32.mrb[59].mxu0 }
 0x163   :  { %1441 = vxpose.xlu0.b32.cont [14/16] (narrow) %v3014_v31, 8  ;;  %1465 = vxpose.xlu1.b32.cont [6/16] (narrow) %v3030_v47, 8  ;;  %v3166_v31 = vpop.f32.mrb[57].mxu1 }
 0x165   :  { %v2242_v27 = vpop.f32.mrb[60].mxu0 }
 0x166   :  { %v961_v23 = vpop.f32.mrb[61].mxu0 }
 0x167   :  { %1442 = vxpose.xlu0.b32.cont [15/16] (narrow) %v3020_v37, 8  ;;  %1466 = vxpose.xlu1.b32.cont [7/16] (narrow) %v3036_v53, 8  ;;  %v3172_v37 = vpop.f32.mrb[58].mxu1 }
 0x168   :  { %v3174_v47 = vpop.f32.mrb[59].mxu1 }
 0x169   :  { %v2245_v48 = vpop.f32.mrb[62].mxu0 }
 0x16a   :  { %v971_v33 = vpop.f32.mrb[63].mxu0 }
 0x16b   :  { %1443 = vxpose.xlu0.b32.end [16/16] (narrow) %v3018_v35, 8  ;;  %1467 = vxpose.xlu1.b32.cont [8/16] (narrow) %v3034_v51, 8  ;;  %v3180_v35 = vpop.f32.mrb[60].mxu1 }
 0x16c   :  { %v1281_v51 = vpop.f32.mrb[61].mxu1 }
 0x16d   :  { %v2341_v53 = vpop.f32.mrb[62].mxu1 }
 0x16f   :  { %1468 = vxpose.xlu1.b32.cont [9/16] (narrow) %v3040_v57, 8  ;;  %1364 = vxpose.xlu0.b32.start [1/16] (narrow) %v3058_v10, 8  ;;  %v3381_v57 = vld [vmem:[#allocation12_spill] sm:$0xff] }
 0x173   :  { %1469 = vxpose.xlu1.b32.cont [10/16] (narrow) %v3038_v55, 8  ;;  %1365 = vxpose.xlu0.b32.cont [2/16] (narrow) %v3054_v6, 8  ;;  %v1291_v55 = vpop.f32.mrb[63].mxu1  ;;  %v1803_v6 = vlaneseq }
 0x175   :  { %v1806_v10 = vand.u32 127, %v1803_v6 }
 0x177   :  { %1470 = vxpose.xlu1.b32.cont [11/16] (narrow) %v3044_v61, 8  ;;  %1366 = vxpose.xlu0.b32.cont [3/16] (narrow) %v3067_v18, 8  ;;  %v3383_v61 = vld [vmem:[#allocation14_spill] sm:$0xff]  ;;  %v3233_v18 = vld [vmem:[%s3372_s3] sm:$0xff]  ;;  %s3242_s3 = sld [smem:[#allocation2]] }
 0x178   :  { %vm1792_vm1 = vcmp.gt.f32.partialorder %v3233_v18, 0.0 }
 0x17b   :  { %1471 = vxpose.xlu1.b32.cont [12/16] (narrow) %v3042_v59, 8  ;;  %1367 = vxpose.xlu0.b32.cont [4/16] (narrow) %v3063_v14, 8  ;;  %v3382_v59 = vld [vmem:[#allocation9_spill] sm:$0xff] }
 0x17f   :  { %1472 = vxpose.xlu1.b32.cont [13/16] (narrow) %v3048_v1, 8  ;;  %1368 = vxpose.xlu0.b32.cont [5/16] (narrow) %v3076_v26, 8  ;;  %v3385_v1 = vld [vmem:[#allocation13_spill] sm:$0xff] }
 0x183   :  { %1473 = vxpose.xlu1.b32.cont [14/16] (narrow) %v3046_v63, 8  ;;  %1369 = vxpose.xlu0.b32.cont [6/16] (narrow) %v3072_v22, 8  ;;  %v3384_v63 = vld [vmem:[#allocation8_spill] sm:$0xff]  ;;  %v2434_v22 = vmov 0.0  }
 0x187   :  { %1474 = vxpose.xlu1.b32.cont [15/16] (narrow) %v3052_v5, 8  ;;  %1370 = vxpose.xlu0.b32.cont [7/16] (narrow) %v3085_v32, 8  ;;  %v3387_v5 = vld [vmem:[#allocation10_spill] sm:$0xff] }
 0x18b   :  { %1475 = vxpose.xlu1.b32.end [16/16] (narrow) %v3050_v3, 8  ;;  %1371 = vxpose.xlu0.b32.cont [8/16] (narrow) %v3081_v9, 8  ;;  %v3386_v3 = vld [vmem:[#allocation11_spill] sm:$0xff] }
 0x18f   :  { %1372 = vxpose.xlu0.b32.cont [9/16] (narrow) %v3094_v38, 8  ;;  %1396 = vxpose.xlu1.b32.start [1/16] (narrow) %v901_v62, 8 }
 0x193   :  { %1373 = vxpose.xlu0.b32.cont [10/16] (narrow) %v3090_v7, 8  ;;  %1397 = vxpose.xlu1.b32.cont [2/16] (narrow) %v3126_v15, 8 }
 0x197   :  { %1374 = vxpose.xlu0.b32.cont [11/16] (narrow) %v3103_v44, 8  ;;  %1398 = vxpose.xlu1.b32.cont [3/16] (narrow) %v911_v4, 8 }
 0x19b   :  { %1375 = vxpose.xlu0.b32.cont [12/16] (narrow) %v3099_v13, 8  ;;  %1399 = vxpose.xlu1.b32.cont [4/16] (narrow) %v3134_v21, 8 }
 0x19f   :  { %1376 = vxpose.xlu0.b32.cont [13/16] (narrow) %v3112_v50, 8  ;;  %1400 = vxpose.xlu1.b32.cont [5/16] (narrow) %v921_v58, 8 }
 0x1a3   :  { %1377 = vxpose.xlu0.b32.cont [14/16] (narrow) %v3108_v11, 8  ;;  %1401 = vxpose.xlu1.b32.cont [6/16] (narrow) %v3140_v2, 8 }
 0x1a7   :  { %1378 = vxpose.xlu0.b32.cont [15/16] (narrow) %v3121_v56, 8  ;;  %1402 = vxpose.xlu1.b32.cont [7/16] (narrow) %v931_v41, 8 }
 0x1ab   :  { %1379 = vxpose.xlu0.b32.end [16/16] (narrow) %v3117_v17, 8  ;;  %1403 = vxpose.xlu1.b32.cont [8/16] (narrow) %v2233_v25, 8 }
 0x1af   :  { %1492 = vxpose.xlu0.b32.start [1/16] (narrow) %v3060_v12, 8  ;;  %1404 = vxpose.xlu1.b32.cont [9/16] (narrow) %v941_v52, 8 }
 0x1b3   :  { %1493 = vxpose.xlu0.b32.cont [2/16] (narrow) %v3056_v8, 8  ;;  %1405 = vxpose.xlu1.b32.cont [10/16] (narrow) %v2236_v39, 8  ;;  %v1804_v8 = vshrl.u32 %v1803_v6, 7 }
 0x1b5   :  { %v1808_v12 = vmul.u32 128, %v1804_v8 }
 0x1b7   :  { %1494 = vxpose.xlu0.b32.cont [3/16] (narrow) %v3069_v20, 8  ;;  %1406 = vxpose.xlu1.b32.cont [11/16] (narrow) %v951_v29, 8  ;;  %v1811_v14 = vadd.s32 %v1808_v12, %v1806_v10  ;;  %v1348_v20 = vpop.trf.xlu1 }
 0x1b8   :  { %v1557_v7 = vrot.slane %v1348_v20, 7 }
 0x1b9   :  { %vm1812_vm2 = vcmp.lt.s32.totalorder %v1811_v14, 16 }
 0x1ba   :  { %v3238_v26 = vsel %vm1812_vm2, 1.0, %v2434_v22 }
 0x1bb   :  { %1495 = vxpose.xlu0.b32.cont [4/16] (narrow) %v3065_v16, 8  ;;  %1407 = vxpose.xlu1.b32.cont [12/16] (narrow) %v2239_v19, 8  ;;  %v1316_v16 = vpop.trf.xlu0 }
 0x1bc   :  { %v1595_v32 = vrot.slane %v1316_v16, 1  ;;  %v1578_v44 = vsel %vm1577_vm3, %v1316_v16, %v1557_v7 }
 0x1bf   :  { %1496 = vxpose.xlu0.b32.cont [5/16] (narrow) %v3078_v28, 8  ;;  %1408 = vxpose.xlu1.b32.cont [13/16] (narrow) %v961_v23, 8  ;;  %v1444_v9 = vpop.trf.xlu0 }
 0x1c0   :  { %v1566_v58 = vrot.slane %v1444_v9, 4  ;;  %v1601_v15 = vrot.slane %v1444_v9, 5 }
 0x1c3   :  { %1497 = vxpose.xlu0.b32.cont [6/16] (narrow) %v3074_v24, 8  ;;  %1409 = vxpose.xlu1.b32.cont [14/16] (narrow) %v2242_v27, 8  ;;  %v3236_v24 = vsel %vm1792_vm1, 1.0, %v2434_v22 }
 0x1c4   :  { %v1817_v28 = vmul.f32 %v3238_v26, %v3236_v24 }
 0x1c6   :  { %1829 = vst [vmem:[#allocation5 + $0x10] sm:$0xff] %v1817_v28 }
 0x1c7   :  { %1498 = vxpose.xlu0.b32.cont [7/16] (narrow) %v3087_v34, 8  ;;  %1410 = vxpose.xlu1.b32.cont [15/16] (narrow) %v971_v33, 8  ;;  %v1619_v34 = vrot.slane %v1316_v16, 2 }
 0x1cb   :  { %1499 = vxpose.xlu0.b32.cont [8/16] (narrow) %v3083_v30, 8  ;;  %1411 = vxpose.xlu1.b32.end [16/16] (narrow) %v2245_v48, 8 }
 0x1cf   :  { %1500 = vxpose.xlu0.b32.cont [9/16] (narrow) %v3096_v40, 8  ;;  %1524 = vxpose.xlu1.b32.start [1/16] (narrow) %v3130_v0, 8  ;;  %v1476_v30 = vpop.trf.xlu1 }
 0x1d0   :  { %v1569_v4 = vrot.slane %v1476_v30, 3  ;;  %v1603_v19 = vrot.slane %v1476_v30, 4  ;;  %v1627_v2 = vrot.slane %v1476_v30, 5 }
 0x1d3   :  { %1501 = vxpose.xlu0.b32.cont [10/16] (narrow) %v3092_v36, 8  ;;  %1525 = vxpose.xlu1.b32.cont [2/16] (narrow) %v3128_v60, 8  ;;  %v1621_v36 = vrot.slane %v1348_v20, 1  ;;  %v1625_v60 = vrot.slane %v1444_v9, 6 }
 0x1d5   :  { %v1633_v11 = vsel %vm1577_vm3, %v1619_v34, %v1621_v36 }
 0x1d7   :  { %1502 = vxpose.xlu0.b32.cont [11/16] (narrow) %v3105_v46, 8  ;;  %1526 = vxpose.xlu1.b32.cont [3/16] (narrow) %v3142_v54, 8  ;;  %v1609_v46 = vsel %vm1577_vm3, %v1595_v32, %v1348_v20 }
 0x1db   :  { %1503 = vxpose.xlu0.b32.cont [12/16] (narrow) %v3101_v42, 8  ;;  %1527 = vxpose.xlu1.b32.cont [4/16] (narrow) %v3381_v57, 8 }
 0x1df   :  { %1504 = vxpose.xlu0.b32.cont [13/16] (narrow) %v3382_v59, 8  ;;  %1528 = vxpose.xlu1.b32.cont [5/16] (narrow) %v3383_v61, 8 }
 0x1e3   :  { %1505 = vxpose.xlu0.b32.cont [14/16] (narrow) %v3384_v63, 8  ;;  %1529 = vxpose.xlu1.b32.cont [6/16] (narrow) %v3385_v1, 8 }
 0x1e7   :  { %1506 = vxpose.xlu0.b32.cont [15/16] (narrow) %v3386_v3, 8  ;;  %1530 = vxpose.xlu1.b32.cont [7/16] (narrow) %v3158_v43, 8 }
 0x1eb   :  { %1507 = vxpose.xlu0.b32.end [16/16] (narrow) %v3387_v5, 8  ;;  %1531 = vxpose.xlu1.b32.cont [8/16] (narrow) %v3156_v45, 8 }
 0x1ef   :  { %1532 = vxpose.xlu1.b32.cont [9/16] (narrow) %v3166_v31, 8  ;;  %v1380_v38 = vpop.trf.xlu0  ;;  %v1592_v31 = vstv %s3242_s3 }
 0x1f0   :  { %v1560_v40 = vrot.slane %v1380_v38, 6  ;;  %v1597_v13 = vrot.slane %v1380_v38, 7  ;;  %v1634_v56 = vsel %vm1579_vm4, %v1633_v11, %v1380_v38 }
 0x1f2   :  { %v1580_v17 = vsel %vm1579_vm4, %v1578_v44, %v1560_v40  ;;  %v1610_v54 = vsel %vm1579_vm4, %v1609_v46, %v1597_v13 }
 0x1f3   :  { %1533 = vxpose.xlu1.b32.cont [10/16] (narrow) %v3164_v49, 8 }
 0x1f7   :  { %1534 = vxpose.xlu1.b32.cont [11/16] (narrow) %v3174_v47, 8 }
 0x1fb   :  { %1535 = vxpose.xlu1.b32.cont [12/16] (narrow) %v3172_v37, 8  ;;  %v1617_v37 = vstv %s3244_s5 }
 0x1ff   :  { %1536 = vxpose.xlu1.b32.cont [13/16] (narrow) %v1281_v51, 8 }
 0x203   :  { %1537 = vxpose.xlu1.b32.cont [14/16] (narrow) %v3180_v35, 8  ;;  %v1641_v35 = vstv %s3246_s6 }
 0x207   :  { %1538 = vxpose.xlu1.b32.cont [15/16] (narrow) %v1291_v55, 8 }
 0x20b   :  { %1539 = vxpose.xlu1.b32.end [16/16] (narrow) %v2341_v53, 8 }
 0x20f   :  { %v1412_v42 = vpop.trf.xlu1 }
 0x210   :  { %v1563_v48 = vrot.slane %v1412_v42, 5  ;;  %v1599_v50 = vrot.slane %v1412_v42, 6  ;;  %v1623_v52 = vrot.slane %v1412_v42, 7 }
 0x212   :  { %v1582_v62 = vsel %vm1581_vm5, %v1580_v17, %v1563_v48  ;;  %v1611_v0 = vsel %vm1581_vm5, %v1610_v54, %v1599_v50  ;;  %v1635_v21 = vsel %vm1581_vm5, %v1634_v56, %v1623_v52 }
 0x213   :  { %v1584_v41 = vsel %vm1583_vm6, %v1582_v62, %v1566_v58  ;;  %v1612_v23 = vsel %vm1583_vm6, %v1611_v0, %v1601_v15  ;;  %v1636_v39 = vsel %vm1583_vm6, %v1635_v21, %v1625_v60 }
 0x214   :  { %v1586_v43 = vsel %vm1585_vm7, %v1584_v41, %v1569_v4  ;;  %v1613_v33 = vsel %vm1585_vm7, %v1612_v23, %v1603_v19  ;;  %v1637_v49 = vsel %vm1585_vm7, %v1636_v39, %v1627_v2 }
 0x22f   :  { %v1508_v25 = vpop.trf.xlu0 }
 0x230   :  { %v1572_v29 = vrot.slane %v1508_v25, 2  ;;  %v1605_v45 = vrot.slane %v1508_v25, 3  ;;  %v1629_v27 = vrot.slane %v1508_v25, 4 }
 0x232   :  { %v1588_v57 = vsel %vm1587_vm8, %v1586_v43, %v1572_v29  ;;  %v1614_v59 = vsel %vm1587_vm8, %v1613_v33, %v1605_v45  ;;  %v1638_v61 = vsel %vm1587_vm8, %v1637_v49, %v1629_v27 }
 0x24f   :  { %v1540_v47 = vpop.trf.xlu1 }
 0x250   :  { %v1575_v51 = vrot.slane %v1540_v47, 1  ;;  %v1607_v53 = vrot.slane %v1540_v47, 2  ;;  %v1631_v55 = vrot.slane %v1540_v47, 3 }
 0x252   :  { %v1590_v63 = vsel %vm1589_vm9, %v1588_v57, %v1575_v51  ;;  %v1615_v1 = vsel %vm1589_vm9, %v1614_v59, %v1607_v53  ;;  %v1639_v3 = vsel %vm1589_vm9, %v1638_v61, %v1631_v55 }
 0x253   :  { %v1593_v5 = vadd.f32 %v1592_v31, %v1590_v63  ;;  %v1618_v6 = vadd.f32 %v1617_v37, %v1615_v1  ;;  %v3251_v8 = vadd.f32 %v1641_v35, %v1639_v3 }
 0x255   :  { %v1644_v10 = vadd.f32 1.1754944e-38, %v1618_v6  ;;  %v1645_v12 = vmul.f32 1.442695, %v1593_v5  ;;  %v3254_v14 = vsub.f32 0.0, %v3251_v8 }
 0x257   :  { %2359 = vpow2.f32 %v1645_v12  ;;  %v1647_v16 = vmul.f32 1.442695, %v1644_v10  ;;  %v1774_v20 = vand.u32 2147483647, %v3254_v14  ;;  %v1772_v49 = vmax.f32 %v3254_v14, 0.0 }
 0x259   :  { %2361 = vpow2.f32 %v1647_v16  ;;  %v1776_v22 = vsub.f32 0.0, %v1774_v20 }
 0x25b   :  { %v1778_v28 = vmul.f32 1.442695, %v1776_v22 }
 0x25d   :  { %2363 = vpow2.f32 %v1778_v28 }
 0x261   :  { %v2360_v9 = vpop.eup %2359 }
 0x262   :  { %v1649_v30 = vmin.f32 %v2360_v9, 10000000.0 }
 0x263   :  { %v3257_v32 = vpop.eup %2361 }
 0x264   :  { %v3259_v34 = vadd.f32 1.1754944e-38, %v1649_v30  ;;  %v3263_v7 = vadd.f32 %v3257_v32, %v3233_v18  ;;  %vm1652_vm10 = vcmp.lt.f32.partialorder %v3257_v32, 0.5  ;;  %v1654_v36 = vadd.f32 1.0, %v3257_v32 }
 0x265   :  { %v3268_v38 = vmul.f32 %v3257_v32, %v1644_v10 }
 0x266   :  { %vm1653_vm11 = vcmp.lt.f32.partialorder %v3263_v7, 0.5  ;;  %v1655_v40 = vadd.f32 1.0, %v3263_v7  ;;  %v3275_v13 = vsel %vm1652_vm10, %v1654_v36, %v3257_v32  ;;  %v1754_v46 = vadd.f32 %v3257_v32, %v3259_v34 }
 0x267   :  { %v2364_v42 = vpop.eup %2363  ;;  %2365 = vrcp.f32 %v3275_v13 }
 0x268   :  { %v3281_v44 = vsel %vm1653_vm11, %v1655_v40, %v3263_v7  ;;  %v1782_v11 = vadd.f32 1.0, %v2364_v42 }
 0x269   :  { %2367 = vrcp.f32 %v3281_v44 }
 0x26a   :  { %2369 = vlog2.f32 %v1754_v46 }
 0x26b   :  { %2371 = vlog2.f32 %v1782_v11 }
 0x271   :  { %v3286_v48 = vpop.eup %2365 }
 0x272   :  { %v1662_v50 = vmul.f32 3409662.8, %v3286_v48  ;;  %v1694_v52 = vmul.f32 5040.0, %v3286_v48 }
 0x273   :  { %v3290_v17 = vpop.eup %2367 }
 0x274   :  { %v1663_v54 = vmul.f32 3409662.8, %v3290_v17  ;;  %v1664_v56 = vadd.f32 4162388.0, %v1662_v50  ;;  %v1695_v58 = vmul.f32 5040.0, %v3290_v17  ;;  %v1696_v15 = vadd.f32 13068.0, %v1694_v52  ;;  %v2370_v60 = vpop.eup %2369 }
 0x275   :  { %v3296_v19 = vmul.f32 0.6931472, %v2370_v60  ;;  %v2372_v2 = vpop.eup %2371 }
 0x276   :  { %v1665_v62 = vadd.f32 4162388.0, %v1663_v54  ;;  %v1666_v0 = vmul.f32 %v3286_v48, %v1664_v56  ;;  %v1697_v21 = vadd.f32 13068.0, %v1695_v58  ;;  %v1698_v4 = vmul.f32 %v3286_v48, %v1696_v15 }
 0x277   :  { %v1769_v33 = vsub.f32 %v1644_v10, %v3296_v19  ;;  %v1785_v31 = vmul.f32 0.6931472, %v2372_v2 }
 0x278   :  { %v1667_v25 = vmul.f32 %v3290_v17, %v1665_v62  ;;  %v1668_v41 = vadd.f32 2222880.5, %v1666_v0  ;;  %v1699_v23 = vmul.f32 %v3290_v17, %v1697_v21  ;;  %v1700_v39 = vadd.f32 13132.0, %v1698_v4 }
 0x279   :  { %v1770_v53 = vmul.f32 %v3257_v32, %v1769_v33  ;;  %v3307_v55 = vadd.f32 %v1785_v31, %v1772_v49  ;;  %v1726_v0 = vadd.f32 6.5, %v3275_v13 }
 0x27a   :  { %v1669_v29 = vadd.f32 2222880.5, %v1667_v25  ;;  %v1670_v45 = vmul.f32 %v3286_v48, %v1668_v41  ;;  %v1701_v27 = vadd.f32 13132.0, %v1699_v23  ;;  %v1702_v43 = vmul.f32 %v3286_v48, %v1700_v39 }
 0x27b   :  { %v3312_v1 = vadd.f32 %v1770_v53, %v3254_v14  ;;  %v1791_v3 = vadd.f32 %v3307_v55, %v3251_v8  ;;  %v1727_v41 = vadd.f32 6.5, %v3281_v44 }
 0x27c   :  { %v1671_v37 = vmul.f32 %v3290_v17, %v1669_v29  ;;  %v1672_v47 = vadd.f32 678289.7, %v1670_v45  ;;  %v1703_v35 = vmul.f32 %v3290_v17, %v1701_v27  ;;  %v1704_v51 = vadd.f32 6769.0, %v1702_v43 }
 0x27d   :  { %v1775_v16 = vand.u32 2147483647, %v3312_v1  ;;  %v1795_v20 = vmul.f32 %v3236_v24, %v1791_v3 }
 0x27e   :  { %v1673_v57 = vadd.f32 678289.7, %v1671_v37  ;;  %v1674_v59 = vmul.f32 %v3286_v48, %v1672_v47  ;;  %v1705_v61 = vadd.f32 6769.0, %v1703_v35  ;;  %v1706_v63 = vmul.f32 %v3286_v48, %v1704_v51 }
 0x27f   :  { %v1777_v30 = vsub.f32 0.0, %v1775_v16  ;;  %v1816_v36 = vmul.f32 %v3238_v26, %v1795_v20 }
 0x280   :  { %v1675_v5 = vmul.f32 %v3290_v17, %v1673_v57  ;;  %v1676_v6 = vadd.f32 129347.26, %v1674_v59  ;;  %v1707_v10 = vmul.f32 %v3290_v17, %v1705_v61  ;;  %v1708_v12 = vadd.f32 1960.0, %v1706_v63 }
 0x281   :  { %v1780_v11 = vmul.f32 1.442695, %v1777_v30  ;;  %1828 = vst [vmem:[#allocation5 + $0x8] sm:$0xff] %v1816_v36 }
 0x282   :  { %v1677_v22 = vadd.f32 129347.26, %v1675_v5  ;;  %v1678_v28 = vmul.f32 %v3286_v48, %v1676_v6  ;;  %v1709_v9 = vadd.f32 1960.0, %v1707_v10  ;;  %v1710_v14 = vmul.f32 %v3286_v48, %v1708_v12 }
 0x283   :  { %2373 = vpow2.f32 %v1780_v11  ;;  %v2006_v5 = vadd.f32 -0.5, %v3275_v13  ;;  %v1773_v12 = vmax.f32 %v3312_v1, 0.0 }
 0x284   :  { %v1679_v8 = vmul.f32 %v3290_v17, %v1677_v22  ;;  %v1680_v40 = vadd.f32 15784.881, %v1678_v28  ;;  %v1711_v42 = vmul.f32 %v3290_v17, %v1709_v9  ;;  %v1712_v46 = vadd.f32 322.0, %v1710_v14 }
 0x285   :  { %2375 = vlog2.f32 %v1726_v0  ;;  %v1796_v28 = vsub.f32 1.0, %v3236_v24 }
 0x286   :  { %v1681_v50 = vadd.f32 15784.881, %v1679_v8  ;;  %v1682_v52 = vmul.f32 %v3286_v48, %v1680_v40  ;;  %v1713_v54 = vadd.f32 322.0, %v1711_v42  ;;  %v1714_v56 = vmul.f32 %v3286_v48, %v1712_v46 }
 0x288   :  { %v1683_v58 = vmul.f32 %v3290_v17, %v1681_v50  ;;  %v1684_v15 = vadd.f32 1203.8342, %v1682_v52  ;;  %v1715_v60 = vmul.f32 %v3290_v17, %v1713_v54  ;;  %v1716_v62 = vadd.f32 28.0, %v1714_v56 }
 0x28a   :  { %v1685_v21 = vadd.f32 1203.8342, %v1683_v58  ;;  %v1717_v4 = vadd.f32 28.0, %v1715_v60  ;;  %v1718_v2 = vmul.f32 %v3286_v48, %v1716_v62  ;;  %v1686_v25 = vmul.f32 %v3286_v48, %v1684_v15 }
 0x28c   :  { %v1719_v23 = vmul.f32 %v3290_v17, %v1717_v4  ;;  %v1720_v39 = vadd.f32 1.0, %v1718_v2  ;;  %v1687_v29 = vmul.f32 %v3290_v17, %v1685_v21  ;;  %v1688_v27 = vadd.f32 52.458332, %v1686_v25 }
 0x28d   :  { %v2374_v43 = vpop.eup %2373  ;;  %v1760_v21 = vmul.f32 %v3296_v19, %v3233_v18 }
 0x28e   :  { %v1721_v45 = vadd.f32 1.0, %v1719_v23  ;;  %2377 = vrcp.f32 %v1720_v39  ;;  %v1689_v33 = vadd.f32 52.458332, %v1687_v29  ;;  %v1783_v49 = vadd.f32 1.0, %v2374_v43 }
 0x28f   :  { %2379 = vlog2.f32 %v1727_v41  ;;  %v1690_v31 = vmul.f32 %v3286_v48, %v1688_v27  ;;  %v2376_v47 = vpop.eup %2375  ;;  %v1766_v23 = vmul.f32 %v3257_v32, %v3296_v19 }
 0x290   :  { %2381 = vrcp.f32 %v1721_v45  ;;  %v1691_v37 = vmul.f32 %v3290_v17, %v1689_v33  ;;  %v1731_v63 = vmul.f32 0.6931472, %v2376_v47  ;;  %v2007_v17 = vadd.f32 -0.5, %v3281_v44 }
 0x291   :  { %2383 = vlog2.f32 %v1783_v49  ;;  %v1692_v35 = vadd.f32 1.0, %v1690_v31 }
 0x292   :  { %v1693_v57 = vadd.f32 1.0, %v1691_v37  ;;  %2385 = vlog2.f32 %v3257_v32  ;;  %v1734_v10 = vmul.f32 %v2006_v5, %v1731_v63 }
 0x294   :  { %v1736_v9 = vadd.f32 0.9189385, %v1734_v10 }
 0x296   :  { %v1738_v42 = vsub.f32 %v1736_v9, %v1726_v0 }
 0x298   :  { %v2378_v51 = vpop.eup %2377 }
 0x299   :  { %v2380_v53 = vpop.eup %2379  ;;  %v1723_v59 = vmul.f32 %v2378_v51, %v1692_v35 }
 0x29a   :  { %v2382_v61 = vpop.eup %2381  ;;  %v1733_v6 = vmul.f32 0.6931472, %v2380_v53 }
 0x29b   :  { %v1725_v3 = vmul.f32 %v2382_v61, %v1693_v57  ;;  %2387 = vlog2.f32 %v1723_v59  ;;  %v2384_v48 = vpop.eup %2383 }
 0x29c   :  { %2389 = vlog2.f32 %v3263_v7  ;;  %v1787_v16 = vmul.f32 0.6931472, %v2384_v48  ;;  %v1735_v20 = vmul.f32 %v2007_v17, %v1733_v6  ;;  %v2386_v14 = vpop.eup %2385 }
 0x29d   :  { %2391 = vlog2.f32 %v1725_v3  ;;  %v1747_v54 = vmul.f32 0.6931472, %v2386_v14 }
 0x29e   :  { %v1789_v22 = vadd.f32 %v1787_v16, %v1773_v12  ;;  %2393 = vlog2.f32 %v3259_v34  ;;  %v1737_v30 = vadd.f32 0.9189385, %v1735_v20 }
 0x2a0   :  { %v1790_v13 = vsub.f32 %v3307_v55, %v1789_v22  ;;  %v1739_v11 = vsub.f32 %v1737_v30, %v1727_v41 }
 0x2a2   :  { %v1797_v8 = vmul.f32 %v1796_v28, %v1790_v13 }
 0x2a4   :  { %v1818_v1 = vmul.f32 %v3238_v26, %v1797_v8 }
 0x2a5   :  { %v2388_v36 = vpop.eup %2387 }
 0x2a6   :  { %v2390_v40 = vpop.eup %2389  ;;  %v1741_v44 = vmul.f32 0.6931472, %v2388_v36  ;;  %1830 = vst [vmem:[#allocation5 + $0x18] sm:$0xff] %v1818_v1 }
 0x2a7   :  { %v2392_v46 = vpop.eup %2391  ;;  %v1749_v56 = vmul.f32 0.6931472, %v2390_v40 }
 0x2a8   :  { %v1743_v50 = vmul.f32 0.6931472, %v2392_v46  ;;  %v1744_v52 = vadd.f32 %v1741_v44, %v1738_v42  ;;  %v2394_v34 = vpop.eup %2393 }
 0x2a9   :  { %v1758_v62 = vmul.f32 0.6931472, %v2394_v34 }
 0x2aa   :  { %v1745_v24 = vadd.f32 %v1743_v50, %v1739_v11  ;;  %v1750_v58 = vsub.f32 %v1744_v52, %v1747_v54 }
 0x2ab   :  { %v1764_v25 = vmul.f32 %v1758_v62, %v3233_v18 }
 0x2ac   :  { %v1751_v55 = vsub.f32 %v1745_v24, %v1749_v56  ;;  %v1752_v15 = vsel %vm1652_vm10, %v1750_v58, %v1744_v52 }
 0x2ae   :  { %v1753_v60 = vsel %vm1653_vm11, %v1751_v55, %v1745_v24 }
 0x2af   :  { %v1759_v0 = vsub.f32 %v1752_v15, %v1753_v60 }
 0x2b1   :  { %v1761_v4 = vadd.f32 %v1760_v21, %v1759_v0 }
 0x2b3   :  { %v1763_v2 = vsub.f32 %v1761_v4, %v3268_v38 }
 0x2b5   :  { %v1765_v41 = vsub.f32 %v1763_v2, %v1764_v25 }
 0x2b7   :  { %v1767_v39 = vadd.f32 %v1766_v23, %v1765_v41 }
 0x2b9   :  { %v1815_v7 = vmul.f32 %v3238_v26, %v1767_v39 }
 0x2bb   :  { %1827 = vst [vmem:[#allocation5] sm:$0xff] %v1815_v7 }
 0x2bc   :  { %2418 = shalt.err (!%p2415_p9)
}
 0x2bd   :  { %s2419_s12 = scalar_lea.hbm %s3373_s4, 512 }
 0x2be   :  { %p2420_p10 = scmp.ne.s32.totalorder %s3373_s4, %s2419_s12  ;;  %p2423_p11 = scmp.lt.u32.totalorder %s2419_s12, %s3373_s4 }
 0x2c0   :  { %p2425_p12 = pnand %p2423_p11, %p2420_p10 }
 0x2c2   :  { %2428 = shalt.err (!%p2425_p12)
}
 0x2c3   :  { %s2436_s17 = smov 128   ;;  %s2437_s18 = smov 8  }
 0x2c4   :  { %1858 = dma.vmem_to_hbm [thread:$0]  %s1853_s8, 512, %s3373_s4, [#allocation3], %s2436_s17, %s2436_s17, %s2437_s18  }
 0x2c5   :  { %2431 = dma.done.wait [#allocation3], 512  }
 0x2c6   :  { %2432 = vsyncadd [#allocation3], 4294966784 }
 0x2c7   :  { %1862 = vsyncpa [#allocation3], 1 }
 0x2c8   :  { %1863 = vsyncpa [#allocation4], 1 }

</bundles_post_ra>
